<compile_context>
chip_gen: v7x
topology: tpu7x:2x2x1
jax: 0.10.0
libtpu: 0.0.40
codegen_flags: <defaults>
</compile_context>

<pallas_src>
import functools

import jax
import jax.numpy as jnp
from jax import lax
from jax.experimental import pallas as pl
from jax.experimental.pallas import tpu as pltpu


def _tcn_kernel_s1(x_ref, w_ref, scale_ref, shift_ref, o_ref, *, K, V, T_out):
    """stride == 1 temporal conv + fused BN, per grid step (NB samples).

    x_ref     : (NB, C, T_pad * V)  f32  lane-dense padded input
    w_ref     : (K, O, C)           f32  per-tap 1x1-conv weights
    scale_ref : (O, 1)              f32  fused BN scale        (gamma / sqrt(var+eps))
    shift_ref : (O, 1)              f32  fused bias + BN shift (beta + scale*(b - mean))
    o_ref     : (NB, O, T_out * V)  f32  lane-dense output
    """
    NB = x_ref.shape[0]
    O = o_ref.shape[1]
    L = T_out * V
    hp = lax.Precision.HIGHEST

    scale = scale_ref[...]            # (O, 1) — hoisted out of the sample loop
    shift = shift_ref[...]            # (O, 1)

    for b in range(NB):               # NB is small & static -> fully unrolled
        acc = jnp.zeros((O, L), jnp.float32)
        for k in range(K):            # K taps -> K (O,C) x (C,L) MXU matmuls
            # stride==1: tap-k window of the flattened (T_pad*V) axis is the
            # contiguous lane range [k*V, k*V + T_out*V).
            xk = x_ref[b, :, pl.ds(k * V, L)]                     # (C, L)
            acc = acc + jnp.dot(w_ref[k], xk, precision=hp,
                                preferred_element_type=jnp.float32)
        # Fused BatchNorm (+ conv bias), single lane-dense store per sample.
        o_ref[b, :, :] = (acc * scale + shift).astype(o_ref.dtype)


def _pick_block_n(n):
    """Samples per grid step: amortize per-step overhead while keeping the grid
    length >= 2 so both TensorCores get work on v7x."""
    for nb in (16, 8, 4, 2):
        if n % nb == 0 and n // nb >= 2:
            return nb
    return 1


def unit_tcn_forward(x, conv_w, conv_b, bn_gamma, bn_beta, bn_mean, bn_var,
                     *, stride=1, eps=1e-5, block_n=None):
    """unit_tcn forward.

    x      : (N, C, T, V) f32
    conv_w : (O, C, K)    f32   (the (K,1) Conv2d weight with the width-1 dim squeezed)
    conv_b : (O,)         f32
    bn_*   : (O,)         f32   BatchNorm2d inference parameters / running stats
    returns: (N, O, T_out, V) f32
    """
    N, C, T, V = x.shape
    O, C_w, K = conv_w.shape
    assert C_w == C, (C_w, C)

    pad = (K - 1) // 2
    T_pad = T + 2 * pad
    T_out = (T_pad - K) // stride + 1
    L = T_out * V

    # Fold BatchNorm (running stats) + conv bias into per-channel scale/shift.
    inv = bn_gamma / jnp.sqrt(bn_var + eps)                       # (O,)
    scale = inv.reshape(O, 1).astype(jnp.float32)
    shift = (bn_beta + inv * (conv_b - bn_mean)).reshape(O, 1).astype(jnp.float32)

    if stride != 1:
        # TODO(synk): stride > 1 temporal conv has no Pallas path here yet
        # (needs sublane-strided windows); fall back to the XLA reference.
        return unit_tcn_reference(x, conv_w, conv_b, bn_gamma, bn_beta,
                                  bn_mean, bn_var, stride=stride, eps=eps)

    # Zero-pad along T (wrapper-side, identical to Conv2d padding=(pad, 0)),
    # then flatten (T_pad, V) -> T_pad*V so the kernel sees a lane-dense block.
    xp = jnp.pad(x.astype(jnp.float32),
                 ((0, 0), (0, 0), (pad, pad), (0, 0)))
    x_flat = xp.reshape(N, C, T_pad * V)

    # Per-tap weight matrices, stacked: (K, O, C) — lives in VMEM, feeds the MXU.
    w_taps = jnp.transpose(conv_w.astype(jnp.float32), (2, 0, 1))

    NB = block_n if block_n is not None else _pick_block_n(N)
    assert N % NB == 0, (N, NB)

    kernel = functools.partial(_tcn_kernel_s1, K=K, V=V, T_out=T_out)

    out_flat = pl.pallas_call(
        kernel,
        out_shape=jax.ShapeDtypeStruct((N, O, L), jnp.float32),
        grid=(N // NB,),
        in_specs=[
            pl.BlockSpec((NB, C, T_pad * V), lambda n: (n, 0, 0)),   # x (NB samples / step)
            pl.BlockSpec((K, O, C), lambda n: (0, 0, 0)),            # per-tap weights
            pl.BlockSpec((O, 1), lambda n: (0, 0)),                  # BN scale
            pl.BlockSpec((O, 1), lambda n: (0, 0)),                  # bias+BN shift
        ],
        out_specs=pl.BlockSpec((NB, O, L), lambda n: (n, 0, 0)),
        compiler_params=pltpu.CompilerParams(dimension_semantics=("parallel",)),
    )(x_flat, w_taps, scale, shift)

    # Pure layout plumbing: contiguous reshape back to (N, O, T_out, V).
    return out_flat.reshape(N, O, T_out, V)


def unit_tcn_reference(x, conv_w, conv_b, bn_gamma, bn_beta, bn_mean, bn_var,
                       *, stride=1, eps=1e-5):
    """Pure-JAX reference mirroring the PyTorch forward (inference-mode BN)."""
    O, C, K = conv_w.shape
    pad = (K - 1) // 2
    y = lax.conv_general_dilated(
        x.astype(jnp.float32), conv_w[..., None].astype(jnp.float32),
        window_strides=(stride, 1), padding=((pad, pad), (0, 0)),
        dimension_numbers=('NCHW', 'OIHW', 'NCHW'),
        precision=lax.Precision.HIGHEST)
    y = y + conv_b[None, :, None, None]
    inv = bn_gamma / jnp.sqrt(bn_var + eps)
    return y * inv[None, :, None, None] + (bn_beta - bn_mean * inv)[None, :, None, None]


if __name__ == "__main__":
    # Small shapes consistent with CTR-GCN usage: V = 25 skeleton joints.
    N, C_in, C_out, T, V = 2, 8, 16, 16, 25
    K, stride = 9, 1

    key = jax.random.PRNGKey(0)
    ks = jax.random.split(key, 4)

    # conv_init: kaiming_normal_(mode='fan_out') on a (K,1) conv -> fan_out = C_out*K.
    std = (2.0 / (C_out * K)) ** 0.5
    conv_w = (std * jax.random.normal(ks[0], (C_out, C_in, K))).astype(jnp.float32)
    conv_b = jnp.zeros((C_out,), jnp.float32)      # conv_init sets bias = 0

    # bn_init(bn, 1): weight = 1, bias = 0.  Use non-trivial running stats so the
    # fused BN scale/shift path is exercised numerically (inference-mode BN).
    bn_gamma = jnp.ones((C_out,), jnp.float32)
    bn_beta = jnp.zeros((C_out,), jnp.float32)
    bn_mean = (0.1 * jax.random.normal(ks[1], (C_out,))).astype(jnp.float32)
    bn_var = (0.5 + jax.nn.softplus(jax.random.normal(ks[2], (C_out,)))).astype(jnp.float32)

    x = jax.random.normal(ks[3], (N, C_in, T, V), jnp.float32)

    out = unit_tcn_forward(x, conv_w, conv_b, bn_gamma, bn_beta, bn_mean, bn_var,
                           stride=stride)
    out = jax.block_until_ready(out)

    ref = unit_tcn_reference(x, conv_w, conv_b, bn_gamma, bn_beta, bn_mean, bn_var,
                             stride=stride)
    assert out.shape == ref.shape == (N, C_out, T, V), (out.shape, ref.shape)
    max_err = float(jnp.max(jnp.abs(out - ref)))
    assert jnp.allclose(out, ref, atol=1e-4, rtol=1e-4), f"max_err={max_err}"

    print("KERNEL_OK")
</pallas_src>

<mosaic_0001>
module attributes {stable_mosaic.version = 11 : i64} {
  func.func @_tcn_kernel_s1(%arg0: i32, %arg1: memref<1x8x600xf32, #tpu.memory_space<vmem>>, %arg2: memref<9x16x8xf32, #tpu.memory_space<vmem>>, %arg3: memref<16x1xf32, #tpu.memory_space<vmem>>, %arg4: memref<16x1xf32, #tpu.memory_space<vmem>>, %arg5: memref<1x16x400xf32, #tpu.memory_space<vmem>>) attributes {dimension_semantics = [#tpu.dimension_semantics<parallel>], iteration_bounds = array<i64: 2>, scalar_prefetch = 0 : i64, scratch_operands = 0 : i64, tpu.core_type = #tpu.core_type<tc>, window_params = [{transform_indices = @transform_0, window_bounds = array<i64: 1, 8, 600>}, {pipeline_mode = #tpu.pipeline_mode<synchronous>, transform_indices = @transform_1, window_bounds = array<i64: 9, 16, 8>}, {pipeline_mode = #tpu.pipeline_mode<synchronous>, transform_indices = @transform_2, window_bounds = array<i64: 16, 1>}, {pipeline_mode = #tpu.pipeline_mode<synchronous>, transform_indices = @transform_3, window_bounds = array<i64: 16, 1>}, {transform_indices = @transform_4, window_bounds = array<i64: 1, 16, 400>}]} {
    %c0 = arith.constant 0 : index
    %c0_0 = arith.constant 0 : index
    %0 = vector.load %arg3[%c0, %c0_0] : memref<16x1xf32, #tpu.memory_space<vmem>>, vector<16x1xf32>
    %c0_1 = arith.constant 0 : index
    %c0_2 = arith.constant 0 : index
    %1 = vector.load %arg4[%c0_1, %c0_2] : memref<16x1xf32, #tpu.memory_space<vmem>>, vector<16x1xf32>
    %cst = arith.constant 0.000000e+00 : f32
    %2 = vector.broadcast %cst : f32 to vector<16x400xf32>
    %c0_3 = arith.constant 0 : index
    %c0_4 = arith.constant 0 : index
    %c0_5 = arith.constant 0 : index
    %3 = vector.load %arg1[%c0_3, %c0_4, %c0_5] : memref<1x8x600xf32, #tpu.memory_space<vmem>>, vector<1x8x400xf32>
    %4 = vector.shape_cast %3 : vector<1x8x400xf32> to vector<8x400xf32>
    %c0_6 = arith.constant 0 : index
    %c0_7 = arith.constant 0 : index
    %c0_8 = arith.constant 0 : index
    %5 = vector.load %arg2[%c0_6, %c0_7, %c0_8] : memref<9x16x8xf32, #tpu.memory_space<vmem>>, vector<1x16x8xf32>
    %6 = vector.shape_cast %5 : vector<1x16x8xf32> to vector<16x8xf32>
    %cst_9 = arith.constant dense<0.000000e+00> : vector<16x400xf32>
    %7 = tpu.matmul %6, %4, %cst_9 {dimension_numbers = #tpu.dot_dimension_numbers<[1], [0], [0], [1], [0, 0, 1, 1], [], []>, precision = #tpu.contract_precision<fp32>} : vector<16x8xf32>, vector<8x400xf32>, vector<16x400xf32> -> vector<16x400xf32>
    %8 = arith.addf %2, %7 : vector<16x400xf32>
    %c0_10 = arith.constant 0 : index
    %c0_11 = arith.constant 0 : index
    %c25 = arith.constant 25 : index
    %9 = vector.load %arg1[%c0_10, %c0_11, %c25] : memref<1x8x600xf32, #tpu.memory_space<vmem>>, vector<1x8x400xf32>
    %10 = vector.shape_cast %9 : vector<1x8x400xf32> to vector<8x400xf32>
    %c1 = arith.constant 1 : index
    %c0_12 = arith.constant 0 : index
    %c0_13 = arith.constant 0 : index
    %11 = vector.load %arg2[%c1, %c0_12, %c0_13] : memref<9x16x8xf32, #tpu.memory_space<vmem>>, vector<1x16x8xf32>
    %12 = vector.shape_cast %11 : vector<1x16x8xf32> to vector<16x8xf32>
    %cst_14 = arith.constant dense<0.000000e+00> : vector<16x400xf32>
    %13 = tpu.matmul %12, %10, %cst_14 {dimension_numbers = #tpu.dot_dimension_numbers<[1], [0], [0], [1], [0, 0, 1, 1], [], []>, precision = #tpu.contract_precision<fp32>} : vector<16x8xf32>, vector<8x400xf32>, vector<16x400xf32> -> vector<16x400xf32>
    %14 = arith.addf %8, %13 : vector<16x400xf32>
    %c0_15 = arith.constant 0 : index
    %c0_16 = arith.constant 0 : index
    %c50 = arith.constant 50 : index
    %15 = vector.load %arg1[%c0_15, %c0_16, %c50] : memref<1x8x600xf32, #tpu.memory_space<vmem>>, vector<1x8x400xf32>
    %16 = vector.shape_cast %15 : vector<1x8x400xf32> to vector<8x400xf32>
    %c2 = arith.constant 2 : index
    %c0_17 = arith.constant 0 : index
    %c0_18 = arith.constant 0 : index
    %17 = vector.load %arg2[%c2, %c0_17, %c0_18] : memref<9x16x8xf32, #tpu.memory_space<vmem>>, vector<1x16x8xf32>
    %18 = vector.shape_cast %17 : vector<1x16x8xf32> to vector<16x8xf32>
    %cst_19 = arith.constant dense<0.000000e+00> : vector<16x400xf32>
    %19 = tpu.matmul %18, %16, %cst_19 {dimension_numbers = #tpu.dot_dimension_numbers<[1], [0], [0], [1], [0, 0, 1, 1], [], []>, precision = #tpu.contract_precision<fp32>} : vector<16x8xf32>, vector<8x400xf32>, vector<16x400xf32> -> vector<16x400xf32>
    %20 = arith.addf %14, %19 : vector<16x400xf32>
    %c0_20 = arith.constant 0 : index
    %c0_21 = arith.constant 0 : index
    %c75 = arith.constant 75 : index
    %21 = vector.load %arg1[%c0_20, %c0_21, %c75] : memref<1x8x600xf32, #tpu.memory_space<vmem>>, vector<1x8x400xf32>
    %22 = vector.shape_cast %21 : vector<1x8x400xf32> to vector<8x400xf32>
    %c3 = arith.constant 3 : index
    %c0_22 = arith.constant 0 : index
    %c0_23 = arith.constant 0 : index
    %23 = vector.load %arg2[%c3, %c0_22, %c0_23] : memref<9x16x8xf32, #tpu.memory_space<vmem>>, vector<1x16x8xf32>
    %24 = vector.shape_cast %23 : vector<1x16x8xf32> to vector<16x8xf32>
    %cst_24 = arith.constant dense<0.000000e+00> : vector<16x400xf32>
    %25 = tpu.matmul %24, %22, %cst_24 {dimension_numbers = #tpu.dot_dimension_numbers<[1], [0], [0], [1], [0, 0, 1, 1], [], []>, precision = #tpu.contract_precision<fp32>} : vector<16x8xf32>, vector<8x400xf32>, vector<16x400xf32> -> vector<16x400xf32>
    %26 = arith.addf %20, %25 : vector<16x400xf32>
    %c0_25 = arith.constant 0 : index
    %c0_26 = arith.constant 0 : index
    %c100 = arith.constant 100 : index
    %27 = vector.load %arg1[%c0_25, %c0_26, %c100] : memref<1x8x600xf32, #tpu.memory_space<vmem>>, vector<1x8x400xf32>
    %28 = vector.shape_cast %27 : vector<1x8x400xf32> to vector<8x400xf32>
    %c4 = arith.constant 4 : index
    %c0_27 = arith.constant 0 : index
    %c0_28 = arith.constant 0 : index
    %29 = vector.load %arg2[%c4, %c0_27, %c0_28] : memref<9x16x8xf32, #tpu.memory_space<vmem>>, vector<1x16x8xf32>
    %30 = vector.shape_cast %29 : vector<1x16x8xf32> to vector<16x8xf32>
    %cst_29 = arith.constant dense<0.000000e+00> : vector<16x400xf32>
    %31 = tpu.matmul %30, %28, %cst_29 {dimension_numbers = #tpu.dot_dimension_numbers<[1], [0], [0], [1], [0, 0, 1, 1], [], []>, precision = #tpu.contract_precision<fp32>} : vector<16x8xf32>, vector<8x400xf32>, vector<16x400xf32> -> vector<16x400xf32>
    %32 = arith.addf %26, %31 : vector<16x400xf32>
    %c0_30 = arith.constant 0 : index
    %c0_31 = arith.constant 0 : index
    %c125 = arith.constant 125 : index
    %33 = vector.load %arg1[%c0_30, %c0_31, %c125] : memref<1x8x600xf32, #tpu.memory_space<vmem>>, vector<1x8x400xf32>
    %34 = vector.shape_cast %33 : vector<1x8x400xf32> to vector<8x400xf32>
    %c5 = arith.constant 5 : index
    %c0_32 = arith.constant 0 : index
    %c0_33 = arith.constant 0 : index
    %35 = vector.load %arg2[%c5, %c0_32, %c0_33] : memref<9x16x8xf32, #tpu.memory_space<vmem>>, vector<1x16x8xf32>
    %36 = vector.shape_cast %35 : vector<1x16x8xf32> to vector<16x8xf32>
    %cst_34 = arith.constant dense<0.000000e+00> : vector<16x400xf32>
    %37 = tpu.matmul %36, %34, %cst_34 {dimension_numbers = #tpu.dot_dimension_numbers<[1], [0], [0], [1], [0, 0, 1, 1], [], []>, precision = #tpu.contract_precision<fp32>} : vector<16x8xf32>, vector<8x400xf32>, vector<16x400xf32> -> vector<16x400xf32>
    %38 = arith.addf %32, %37 : vector<16x400xf32>
    %c0_35 = arith.constant 0 : index
    %c0_36 = arith.constant 0 : index
    %c150 = arith.constant 150 : index
    %39 = vector.load %arg1[%c0_35, %c0_36, %c150] : memref<1x8x600xf32, #tpu.memory_space<vmem>>, vector<1x8x400xf32>
    %40 = vector.shape_cast %39 : vector<1x8x400xf32> to vector<8x400xf32>
    %c6 = arith.constant 6 : index
    %c0_37 = arith.constant 0 : index
    %c0_38 = arith.constant 0 : index
    %41 = vector.load %arg2[%c6, %c0_37, %c0_38] : memref<9x16x8xf32, #tpu.memory_space<vmem>>, vector<1x16x8xf32>
    %42 = vector.shape_cast %41 : vector<1x16x8xf32> to vector<16x8xf32>
    %cst_39 = arith.constant dense<0.000000e+00> : vector<16x400xf32>
    %43 = tpu.matmul %42, %40, %cst_39 {dimension_numbers = #tpu.dot_dimension_numbers<[1], [0], [0], [1], [0, 0, 1, 1], [], []>, precision = #tpu.contract_precision<fp32>} : vector<16x8xf32>, vector<8x400xf32>, vector<16x400xf32> -> vector<16x400xf32>
    %44 = arith.addf %38, %43 : vector<16x400xf32>
    %c0_40 = arith.constant 0 : index
    %c0_41 = arith.constant 0 : index
    %c175 = arith.constant 175 : index
    %45 = vector.load %arg1[%c0_40, %c0_41, %c175] : memref<1x8x600xf32, #tpu.memory_space<vmem>>, vector<1x8x400xf32>
    %46 = vector.shape_cast %45 : vector<1x8x400xf32> to vector<8x400xf32>
    %c7 = arith.constant 7 : index
    %c0_42 = arith.constant 0 : index
    %c0_43 = arith.constant 0 : index
    %47 = vector.load %arg2[%c7, %c0_42, %c0_43] : memref<9x16x8xf32, #tpu.memory_space<vmem>>, vector<1x16x8xf32>
    %48 = vector.shape_cast %47 : vector<1x16x8xf32> to vector<16x8xf32>
    %cst_44 = arith.constant dense<0.000000e+00> : vector<16x400xf32>
    %49 = tpu.matmul %48, %46, %cst_44 {dimension_numbers = #tpu.dot_dimension_numbers<[1], [0], [0], [1], [0, 0, 1, 1], [], []>, precision = #tpu.contract_precision<fp32>} : vector<16x8xf32>, vector<8x400xf32>, vector<16x400xf32> -> vector<16x400xf32>
    %50 = arith.addf %44, %49 : vector<16x400xf32>
    %c0_45 = arith.constant 0 : index
    %c0_46 = arith.constant 0 : index
    %c200 = arith.constant 200 : index
    %51 = vector.load %arg1[%c0_45, %c0_46, %c200] : memref<1x8x600xf32, #tpu.memory_space<vmem>>, vector<1x8x400xf32>
    %52 = vector.shape_cast %51 : vector<1x8x400xf32> to vector<8x400xf32>
    %c8 = arith.constant 8 : index
    %c0_47 = arith.constant 0 : index
    %c0_48 = arith.constant 0 : index
    %53 = vector.load %arg2[%c8, %c0_47, %c0_48] : memref<9x16x8xf32, #tpu.memory_space<vmem>>, vector<1x16x8xf32>
    %54 = vector.shape_cast %53 : vector<1x16x8xf32> to vector<16x8xf32>
    %cst_49 = arith.constant dense<0.000000e+00> : vector<16x400xf32>
    %55 = tpu.matmul %54, %52, %cst_49 {dimension_numbers = #tpu.dot_dimension_numbers<[1], [0], [0], [1], [0, 0, 1, 1], [], []>, precision = #tpu.contract_precision<fp32>} : vector<16x8xf32>, vector<8x400xf32>, vector<16x400xf32> -> vector<16x400xf32>
    %56 = arith.addf %50, %55 : vector<16x400xf32>
    %57 = vector.broadcast %0 : vector<16x1xf32> to vector<16x400xf32>
    %58 = arith.mulf %56, %57 : vector<16x400xf32>
    %59 = vector.broadcast %1 : vector<16x1xf32> to vector<16x400xf32>
    %60 = arith.addf %58, %59 : vector<16x400xf32>
    %c0_50 = arith.constant 0 : index
    %c0_51 = arith.constant 0 : index
    %c0_52 = arith.constant 0 : index
    %61 = vector.load %arg5[%c0_50, %c0_51, %c0_52] : memref<1x16x400xf32, #tpu.memory_space<vmem>>, vector<1x16x400xf32>
    %62 = vector.shape_cast %61 : vector<1x16x400xf32> to vector<16x400xf32>
    %63 = vector.shape_cast %60 : vector<16x400xf32> to vector<1x16x400xf32>
    tpu.vector_store %arg5[%c0_50, %c0_51, %c0_52], %63 {strides = array<i32>} : memref<1x16x400xf32, #tpu.memory_space<vmem>>, vector<1x16x400xf32>,
    return
  }
  func.func @transform_0(%arg0: i32) -> (i32, i32, i32) {
    %c0_i32 = arith.constant 0 : i32
    %c0_i32_0 = arith.constant 0 : i32
    %c0_i32_1 = arith.constant 0 : i32
    return %arg0, %c0_i32, %c0_i32_0 : i32, i32, i32
  }
  func.func @transform_1(%arg0: i32) -> (i32, i32, i32) {
    %c0_i32 = arith.constant 0 : i32
    %c0_i32_0 = arith.constant 0 : i32
    %c0_i32_1 = arith.constant 0 : i32
    %c0_i32_2 = arith.constant 0 : i32
    return %c0_i32, %c0_i32_0, %c0_i32_1 : i32, i32, i32
  }
  func.func @transform_2(%arg0: i32) -> (i32, i32) {
    %c0_i32 = arith.constant 0 : i32
    %c0_i32_0 = arith.constant 0 : i32
    %c0_i32_1 = arith.constant 0 : i32
    return %c0_i32, %c0_i32_0 : i32, i32
  }
  func.func @transform_3(%arg0: i32) -> (i32, i32) {
    %c0_i32 = arith.constant 0 : i32
    %c0_i32_0 = arith.constant 0 : i32
    %c0_i32_1 = arith.constant 0 : i32
    return %c0_i32, %c0_i32_0 : i32, i32
  }
  func.func @transform_4(%arg0: i32) -> (i32, i32, i32) {
    %c0_i32 = arith.constant 0 : i32
    %c0_i32_0 = arith.constant 0 : i32
    %c0_i32_1 = arith.constant 0 : i32
    return %arg0, %c0_i32, %c0_i32_0 : i32, i32, i32
  }
}

</mosaic_0001>

<bundles_post_ra>
// kernel: tpu_custom_call.1
= control target key start
LH: loop header
LB: loop body
LE: loop exit
PB: predicated region body
PF: predicated region fallthrough
CT: control target
= control target key end

     0   :  { %9 = vsyncpa [#allocation3], 0  ;;  %s11823_s0 = inlined_call_operand.vmem [shape: f32[2,8,600], index: 0, kind: input, shape index: {}]   ;;  %s11824_s1 = inlined_call_operand.vmem [shape: f32[9,16,8], index: 1, kind: input, shape index: {}]   ;;  %s11825_s2 = inlined_call_operand.vmem [shape: f32[16,1], index: 2, kind: input, shape index: {}]   ;;  %s11826_s3 = inlined_call_operand.vmem [shape: f32[16,1], index: 3, kind: input, shape index: {}]   ;;  %s11827_s4 = inlined_call_operand.hbm [shape: f32[2,16,400], index: 4, kind: output, shape index: {}]  }
   0x1   :  { %11 = vsyncpa [#allocation3 + $0x1], 0  ;;  %s10467_s15 = smov 0   ;;  %s10469_s16 = smov 0  }
   0x2   :  { %s10471_s17 = smov 0   ;;  %s10473_s18 = smov 0  }
   0x3 LB: > { %s10488_s19 = sadd.s32 4294967295, %s10427_s18   ;;  %s9859_s20 = sadd.s32 4294967294, %s10427_s18   ;;  %s10427_s18 = sphi %s10473_s18, %s11833_s18   ;;  %s10423_s17 = sphi %s10471_s17, %s11832_s17   ;;  %s10419_s16 = sphi %s10469_s16, %s11831_s16   ;;  %s10415_s15 = sphi %s10467_s15, %s11830_s15  }
   0x4   : > { %s10492_s21 = sadd.s32 1, %s10427_s18   ;;  %s113_s22 = sadd.s32 1, %s10423_s17 }
   0x5   : > { %s110_s23 = ssub.s32 %s10427_s18, %s10492_s21  ;;  %p123_p0 = scmp.ne.s32.totalorder %s10423_s17, %s10419_s16 }
   0x6   : > { %p111_p1 = scmp.eq.s32.totalorder %s110_s23, 0  ;;  %p124_p2 = scmp.eq.s32.totalorder %s10488_s19, 1 }
   0x7   : > { %p129_p3 = scmp.ne.s32.totalorder %s10419_s16, %s10415_s15  ;;  %p130_p4 = scmp.eq.s32.totalorder %s9859_s20, 1 }
   0x8   : > { %s10503_s24 = scalar_select %p111_p1, %s10423_s17, %s113_s22  }
   0x9   : > { %p10505_p5 = por %p124_p2, %p123_p0  ;;  %p10509_p6 = por %p130_p4, %p129_p3 }
   0xa   : > { %p9862_p7 = scmp.ge.s32.totalorder %s10427_s18, 1  ;;  %p165_p8 = scmp.lt.s32.totalorder %s10427_s18, 3 }
   0xc   : > { %p166_p9 = pnand %p9862_p7, %p165_p8 }
   0xd   : > { %p191_p10 = scmp.lt.s32.totalorder (!%p166_p9), %s10488_s19, 1  ;;  %v10429_v0 = vmov (!%p166_p9), 0.0   ;;  %s10430_s6 = smov (!%p166_p9), 103   ;;  %v9865_v5 = vld [vmem:[%s11824_s1 + $0x10] sm:$0xff] (!%p166_p9)  ;;  %vm229_vm0 = vcmask (!%p166_p9), 64512   ;;  %v9866_v7 = vld [vmem:[%s11824_s1 + $0x18] sm:$0xff] (!%p166_p9) }
   0xe   : > { %169 = sbr.rel (%p166_p9) target bundleno = 812 (0x32c), region = 36  ;;  %816 = vmatprep.mubr.f32.mxu1 (!%p166_p9), %v10429_v0  ;;  %302 = vmatprep.mubr.f32.mxu0 (!%p166_p9), %v10429_v0  ;;  %s10431_s7 = smov (!%p166_p9), 78   ;;  %v231_v6 = vsel (!%p166_p9), %vm229_vm0, %v9865_v5, 0  ;;  %v234_v9 = vsel (!%p166_p9), %vm229_vm0, %v9866_v7, 0  ;;  %vm221_vm1 = vcmask (!%p166_p9), 842752   ;;  %v204_v47 = vld [vmem:[%s11824_s1] sm:$0xff] (!%p166_p9) }
   0xf   : > { %s10432_s8 = smov (!%p166_p9), 53   ;;  %s10433_s9 = smov (!%p166_p9), 28   ;;  %v10562_v8 = vand.u32 (!%p166_p9), 4294901760, %v231_v6  ;;  %v10565_v10 = vand.u32 (!%p166_p9), 4294901760, %v234_v9  ;;  %v1265_v50 = vsel (!%p166_p9), %vm229_vm0, %v204_v47, 0  ;;  %v205_v51 = vld [vmem:[%s11824_s1 + $0x8] sm:$0xff] (!%p166_p9) }
  0x10   : > { %s10434_s12 = smov (!%p166_p9), 3   ;;  %v10661_v53 = vand.u32 (!%p166_p9), 4294901760, %v1265_v50  ;;  %v1268_v55 = vsel (!%p166_p9), %vm229_vm0, %v205_v51, 0  ;;  %vm2309_vm2 = vcmask (!%p166_p9), 637952   ;;  %vm3370_vm3 = vcmask (!%p166_p9), 433152   ;;  %s9886_s10 = sshll.u32 (!%p166_p9), %s10488_s19, 10 }
  0x11   : > { %v10569_v11 = vsub.f32 (!%p166_p9), %v231_v6, %v10562_v8  ;;  %v10575_v13 = vsub.f32 (!%p166_p9), %v234_v9, %v10565_v10  ;;  %v10684_v60 = vand.u32 (!%p166_p9), 4294901760, %v1268_v55  ;;  %vm4431_vm4 = vcmask (!%p166_p9), 228352   ;;  %s11775_s14 = scalar_lea.hbm (!%p166_p9), %s11827_s4, %s9886_s10  ;;  %s10439_s22 = smov (!%p166_p9), [#allocation2]  }
  0x12   : > { %v10682_v59 = vsub.f32 (!%p166_p9), %v1265_v50, %v10661_v53  ;;  %vm5504_vm5 = vcmask (!%p166_p9), 23552   ;;  %vm6566_vm6 = vcmask (!%p166_p9), 867328   ;;  %vm7627_vm7 = vcmask (!%p166_p9), 662528   ;;  %s10369_s23 = sshll.u32 (!%p166_p9), %s10439_s22, 4  ;;  %s10370_s23 = int_to_ptr.vmem [resolvable:$false] %s10369_s23 }
  0x13   : > { %v10579_v14 = vand.u32 (!%p166_p9), 4294901760, %v10569_v11  ;;  %v10582_v17 = vand.u32 (!%p166_p9), 4294901760, %v10575_v13  ;;  %v10710_v7 = vsub.f32 (!%p166_p9), %v1268_v55, %v10684_v60  ;;  %vm8688_vm8 = vcmask (!%p166_p9), 457728  }
  0x14   : > { %v10707_v6 = vand.u32 (!%p166_p9), 4294901760, %v10682_v59  ;;  %vm9777_vm9 = vcmask (!%p166_p9), 130048  }
  0x15   : > { %s192_s27 = scalar_select %p191_p10, %s10488_s19, 1  ;;  %v306_v19 = vsub.f32 %v10569_v11, %v10579_v14  ;;  %v317_v24 = vsub.f32 %v10575_v13, %v10582_v17 }
  0x17   : > { %s10311_s28 = smul.u32 40, %s192_s27  ;;  %v307_v28 = vand.u32 4294901760, %v306_v19  ;;  %v318_v35 = vand.u32 4294901760, %v317_v24  ;;  %s10371_s27 = scalar_lea.vmem %s10370_s23, 2048 }
  0x19   : > { %s10522_s5 = scalar_lea.vmem %s11823_s0, %s10311_s28  ;;  %s10435_s28 = smov 106  }
  0x1a   : > { %v10525_v1 = vld [vmem:[%s10522_s5 + $0x8] sm:$0xff]  ;;  %v10528_v2 = vld [vmem:[%s10522_s5] sm:$0xff]  ;;  %v10533_v3 = vld [vmem:[%s10522_s5 + $0x10] sm:$0xff] }
  0x1b   : > { %215 = vrot.lane.b32.xlu0 %v10525_v1, %s10430_s6  ;;  %213 = vrot.lane.b32.xlu1 %v10528_v2, %s10430_s6  ;;  %v10536_v4 = vld [vmem:[%s10522_s5 + $0x18] sm:$0xff]  ;;  %v10572_v12 = vld [vmem:[%s10522_s5 + $0x20] sm:$0xff]  ;;  %v10643_v49 = vand.u32 4294901760, %v10525_v1  ;;  %v10672_v56 = vand.u32 4294901760, %v10533_v3  ;;  %v10676_v57 = vand.u32 4294901760, %v10528_v2 }
  0x1c   : > { %v10639_v48 = vand.u32 4294901760, %v10536_v4 }
  0x1d   : > { %v10665_v54 = vsub.f32 %v10525_v1, %v10643_v49  ;;  %v10693_v62 = vsub.f32 %v10533_v3, %v10672_v56  ;;  %v10702_v5 = vsub.f32 %v10528_v2, %v10676_v57 }
  0x1e   : > { %v10657_v52 = vsub.f32 %v10536_v4, %v10639_v48 }
  0x1f   : > { %217 = vrot.lane.b32.xlu0 %v10533_v3, %s10430_s6  ;;  %219 = vrot.lane.b32.xlu1 %v10536_v4, %s10430_s6  ;;  %v1361_v61 = vand.u32 4294901760, %v10665_v54 }
  0x20   : > { %v1875_v58 = vand.u32 4294901760, %v10657_v52 }
  0x21   : > { %v1362_v9 = vsub.f32 %v10665_v54, %v1361_v61 }
  0x22   : > { %v1876_v63 = vsub.f32 %v10657_v52, %v1875_v58 }
  0x23   : > { %2303 = vrot.lane.b32.xlu0 %v10525_v1, %s10431_s7  ;;  %2305 = vrot.lane.b32.xlu1 %v10533_v3, %s10431_s7 }
  0x27   : > { %2301 = vrot.lane.b32.xlu0 %v10528_v2, %s10431_s7  ;;  %2307 = vrot.lane.b32.xlu1 %v10536_v4, %s10431_s7  ;;  %s10436_s7 = smov 81  }
  0x2b   : > { %3364 = vrot.lane.b32.xlu0 %v10525_v1, %s10432_s8  ;;  %3366 = vrot.lane.b32.xlu1 %v10533_v3, %s10432_s8 }
  0x2f   : > { %3362 = vrot.lane.b32.xlu0 %v10528_v2, %s10432_s8  ;;  %3368 = vrot.lane.b32.xlu1 %v10536_v4, %s10432_s8 }
  0x33   : > { %4425 = vrot.lane.b32.xlu0 %v10525_v1, %s10433_s9  ;;  %4427 = vrot.lane.b32.xlu1 %v10533_v3, %s10433_s9 }
  0x37   : > { %4423 = vrot.lane.b32.xlu0 %v10528_v2, %s10433_s9  ;;  %4429 = vrot.lane.b32.xlu1 %v10536_v4, %s10433_s9 }
  0x3b   : > { %5496 = vrot.lane.b32.xlu0 %v10525_v1, %s10434_s12  ;;  %5498 = vrot.lane.b32.xlu1 %v10533_v3, %s10434_s12 }
  0x3f   : > { %5500 = vrot.lane.b32.xlu0 %v10536_v4, %s10434_s12  ;;  %5502 = vrot.lane.b32.xlu1 %v10572_v12, %s10434_s12 }
  0x43   : > { %5494 = vrot.lane.b32.xlu0 %v10528_v2, %s10434_s12  ;;  %6560 = vrot.lane.b32.xlu1 %v10533_v3, %s10435_s28  ;;  %v1881_v2 = vand.u32 4294901760, %v10693_v62  ;;  %s10437_s12 = smov 56  }
  0x47   : > { %6562 = vrot.lane.b32.xlu0 %v10536_v4, %s10435_s28  ;;  %6558 = vrot.lane.b32.xlu1 %v10525_v1, %s10435_s28 }
  0x4b   : > { %6564 = vrot.lane.b32.xlu0 %v10572_v12, %s10435_s28  ;;  %7621 = vrot.lane.b32.xlu1 %v10533_v3, %s10436_s7 }
  0x4f   : > { %7623 = vrot.lane.b32.xlu0 %v10536_v4, %s10436_s7  ;;  %7619 = vrot.lane.b32.xlu1 %v10525_v1, %s10436_s7 }
  0x53   : > { %7625 = vrot.lane.b32.xlu0 %v10572_v12, %s10436_s7  ;;  %8682 = vrot.lane.b32.xlu1 %v10533_v3, %s10437_s12  ;;  %s188_s7 = sand.u32 1, %s10419_s16  }
  0x54   : > { %s9863_s8 = sshll.u32 %s188_s7, 6  ;;  %s11782_s19 = scalar_lea.sflag [#allocation3], %s188_s7 }
  0x55   : > { %s190_s9 = scalar_lea.vmem [#allocation2], %s9863_s8 }
  0x56   : > { %s9797_s11 = sshll.u32 %s190_s9, 4  ;;  %s11777_s11 = int_to_ptr.vmem [resolvable:$true] %s9797_s11 }
  0x57   : > { %8684 = vrot.lane.b32.xlu0 %v10536_v4, %s10437_s12  ;;  %8680 = vrot.lane.b32.xlu1 %v10525_v1, %s10437_s12  ;;  %s10365_s20 = scalar_lea.vmem %s11777_s11, 1024  ;;  %p10372_p0 = scmp.lt.s32.totalorder %s11777_s11, %s10370_s23 }
  0x58   : > { %p10366_p11 = scmp.ne.s32.totalorder %s11777_s11, %s10365_s20  ;;  %p10373_p1 = scmp.lt.s32.totalorder %s10371_s27, %s10365_s20 }
  0x5a   : > { %p10367_p12 = pnand %p10366_p11, %p10505_p5  ;;  %p10374_p2 = por %p10373_p1, %p10372_p0 }
  0x5b   : > { %8686 = vrot.lane.b32.xlu0 %v10572_v12, %s10437_s12 }
  0x5c   : > { %p10368_p13 = pneg %p10367_p12 }
  0x5e   : > { %p10375_p3 = pnand %p10374_p2, %p10368_p13 }
  0x8d   : > { %v216_v15 = vpop.permute.xlu0 %215  ;;  %v214_v16 = vpop.permute.xlu1 %213 }
  0x8e   : > { %v222_v18 = vsel %vm221_vm1, %v214_v16, %v216_v15  ;;  %v1363_v16 = vand.u32 4294901760, %v1362_v9  ;;  %v9869_v9 = vld [vmem:[%s11824_s1 + $0x30] sm:$0xff] }
  0x8f   : > { %v10586_v20 = vand.u32 4294901760, %v222_v18 }
  0x91   : > { %v10589_v21 = vsub.f32 %v222_v18, %v10586_v20  ;;  %v218_v22 = vpop.permute.xlu0 %217  ;;  %v220_v23 = vpop.permute.xlu1 %219 }
  0x92   : > { %v223_v25 = vsel %vm221_vm1, %v216_v15, %v218_v22  ;;  %v224_v26 = vsel %vm221_vm1, %v218_v22, %v220_v23  ;;  %v10593_v27 = vand.u32 4294901760, %v220_v23  ;;  %v10726_v15 = vand.u32 4294901760, %v10710_v7 }
  0x93   : > { %v10595_v29 = vand.u32 4294901760, %v223_v25  ;;  %v10597_v30 = vand.u32 4294901760, %v224_v26  ;;  %v333_v31 = vand.u32 4294901760, %v10589_v21 }
  0x94   : > { %v840_v32 = vsub.f32 %v220_v23, %v10593_v27  ;;  %751 = vmatprep.subr.mxu1 %v10593_v27  ;;  %v1351_v19 = vsub.f32 %v10710_v7, %v10726_v15 }
  0x95   : > { %v326_v33 = vsub.f32 %v223_v25, %v10595_v29  ;;  %v846_v34 = vsub.f32 %v224_v26, %v10597_v30  ;;  %237 = vmatprep.subr.mxu0 %v10595_v29  ;;  %753 = vmatpush1.msra.mxu1 %v10597_v30  ;;  %v334_v39 = vsub.f32 %v10589_v21, %v333_v31  ;;  %v2304_v23 = vpop.permute.xlu0 %2303  ;;  %v9867_v26 = vld [vmem:[%s11824_s1 + $0x20] sm:$0xff] }
  0x96   : > { %239 = vmatpush1.msra.mxu0 %v10586_v20  ;;  %822 = vmatmul.mubr.f32.vlgmr.msra.gmra.mrb[0].mxu1 %v307_v28  ;;  %v841_v36 = vand.u32 4294901760, %v840_v32  ;;  %v1352_v22 = vand.u32 4294901760, %v1351_v19 }
  0x97   : > { %v847_v37 = vand.u32 4294901760, %v846_v34  ;;  %308 = vmatmul.mubr.f32.vlgmr.msra.gmra.mrb[0].mxu0 %v307_v28  ;;  %827 = vmatprep.mubr.f32.mxu1 %v10429_v0  ;;  %v327_v38 = vand.u32 4294901760, %v326_v33  ;;  %v335_v46 = vand.u32 4294901760, %v334_v39 }
  0x98   : > { %313 = vmatprep.mubr.f32.mxu0 %v10429_v0  ;;  %v842_v40 = vsub.f32 %v840_v32, %v841_v36 }
  0x99   : > { %v328_v41 = vsub.f32 %v326_v33, %v327_v38  ;;  %v848_v42 = vsub.f32 %v846_v34, %v847_v37  ;;  %v2302_v28 = vpop.permute.xlu0 %2301 }
  0x9a   : > { %833 = vmatmul.mubr.f32.gmra.mrb[2].mxu1 %v318_v35  ;;  %v843_v43 = vand.u32 4294901760, %v842_v40 }
  0x9b   : > { %319 = vmatmul.mubr.f32.gmra.mrb[2].mxu0 %v318_v35  ;;  %v329_v44 = vand.u32 4294901760, %v328_v41  ;;  %v849_v45 = vand.u32 4294901760, %v848_v42  ;;  %913 = vmatprep.mubr.f32.mxu1 %v10429_v0 }
  0x9c   : > { %844 = vmatprep.subr.mxu1 %v843_v43  ;;  %399 = vmatprep.mubr.f32.mxu0 %v10429_v0 }
  0x9d   : > { %330 = vmatprep.subr.mxu0 %v329_v44  ;;  %850 = vmatpush1.msra.mxu1 %v849_v45 }
  0x9e   : > { %336 = vmatpush1.msra.mxu0 %v335_v46  ;;  %915 = vmatmul.mubr.f32.vlgmr.msra.gmra.mrb[0].mxu1 %v10562_v8 }
  0x9f   : > { %930 = vmatprep.subr.mxu1 %v840_v32  ;;  %401 = vmatmul.mubr.f32.vlgmr.msra.gmra.mrb[0].mxu0 %v10562_v8  ;;  %v9868_v32 = vld [vmem:[%s11824_s1 + $0x28] sm:$0xff] }
  0xa0   : > { %416 = vmatprep.subr.mxu0 %v326_v33  ;;  %933 = vmatpush1.msra.mxu1 %v846_v34  ;;  %v2310_v34 = vsel %vm2309_vm2, %v2302_v28, %v2304_v23 }
  0xa1   : > { %419 = vmatpush1.msra.mxu0 %v10589_v21  ;;  %1014 = vmatprep.subr.mxu1 %v10593_v27  ;;  %v10816_v39 = vand.u32 4294901760, %v2310_v34 }
  0xa2   : > { %500 = vmatprep.subr.mxu0 %v10595_v29  ;;  %920 = vmatprep.mubr.f32.mxu1 %v10429_v0 }
  0xa3   : > { %406 = vmatprep.mubr.f32.mxu0 %v10429_v0  ;;  %922 = vmatmul.mubr.f32.gmra.mrb[2].mxu1 %v10565_v10  ;;  %v10834_v45 = vsub.f32 %v2310_v34, %v10816_v39 }
  0xa4   : > { %408 = vmatmul.mubr.f32.gmra.mrb[2].mxu0 %v10565_v10  ;;  %996 = vmatprep.mubr.f32.mxu1 %v10429_v0 }
  0xa5   : > { %482 = vmatprep.mubr.f32.mxu0 %v10429_v0  ;;  %v2420_v51 = vand.u32 4294901760, %v10834_v45 }
  0xa7   : > { %999 = vmatmul.mubr.f32.vlgmr.msra.gmra.mrb[0].mxu1 %v10569_v11 }
  0xa8   : > { %1016 = vmatpush1.msra.mxu1 %v10597_v30  ;;  %485 = vmatmul.mubr.f32.vlgmr.msra.gmra.mrb[0].mxu0 %v10569_v11  ;;  %v1877_v11 = vand.u32 4294901760, %v1876_v63 }
  0xa9   : > { %502 = vmatpush1.msra.mxu0 %v10586_v20  ;;  %1101 = vmatprep.subr.mxu1 %v841_v36 }
  0xaa   : > { %587 = vmatprep.subr.mxu0 %v327_v38  ;;  %1004 = vmatprep.mubr.f32.mxu1 %v10429_v0  ;;  %v2321_v38 = vsel %vm229_vm0, %v9868_v32, 0 }
  0xab   : > { %490 = vmatprep.mubr.f32.mxu0 %v10429_v0  ;;  %1007 = vmatmul.mubr.f32.gmra.mrb[2].mxu1 %v10575_v13  ;;  %v10826_v43 = vand.u32 4294901760, %v2321_v38 }
  0xac   : > { %493 = vmatmul.mubr.f32.gmra.mrb[2].mxu0 %v10575_v13  ;;  %1079 = vmatprep.mubr.f32.mxu1 %v10429_v0  ;;  %v1367_v13 = vand.u32 4294901760, %v10702_v5 }
  0xad   : > { %565 = vmatprep.mubr.f32.mxu0 %v10429_v0 }
  0xae   : > { %v1368_v18 = vsub.f32 %v10702_v5, %v1367_v13 }
  0xaf   : > { %1083 = vmatmul.mubr.f32.vlgmr.msra.gmra.mrb[0].mxu1 %v10579_v14 }
  0xb0   : > { %1105 = vmatpush1.msra.mxu1 %v847_v37  ;;  %569 = vmatmul.mubr.f32.vlgmr.msra.gmra.mrb[0].mxu0 %v10579_v14  ;;  %v1340_v14 = vsub.f32 %v10682_v59, %v10707_v6  ;;  %v1369_v21 = vand.u32 4294901760, %v1368_v18 }
  0xb1   : > { %591 = vmatpush1.msra.mxu0 %v333_v31  ;;  %1184 = vmatprep.subr.mxu1 %v10593_v27 }
  0xb2   : > { %670 = vmatprep.subr.mxu0 %v10595_v29  ;;  %1088 = vmatprep.mubr.f32.mxu1 %v10429_v0 }
  0xb3   : > { %574 = vmatprep.mubr.f32.mxu0 %v10429_v0  ;;  %1092 = vmatmul.mubr.f32.gmra.mrb[2].mxu1 %v10582_v17 }
  0xb4   : > { %578 = vmatmul.mubr.f32.gmra.mrb[2].mxu0 %v10582_v17  ;;  %1168 = vmatprep.mubr.f32.mxu1 %v10429_v0  ;;  %v1882_v17 = vsub.f32 %v10693_v62, %v1881_v2 }
  0xb5   : > { %654 = vmatprep.mubr.f32.mxu0 %v10429_v0 }
  0xb7   : > { %1170 = vmatmul.mubr.f32.vlgmr.msra.gmra.mrb[0].mxu1 %v10562_v8 }
  0xb8   : > { %1186 = vmatpush1.msra.mxu1 %v10597_v30  ;;  %656 = vmatmul.mubr.f32.vlgmr.msra.gmra.mrb[0].mxu0 %v10562_v8  ;;  %v2318_v30 = vsel %vm229_vm0, %v9867_v26, 0 }
  0xb9   : > { %672 = vmatpush1.msra.mxu0 %v10586_v20  ;;  %1175 = vmatprep.mubr.f32.mxu1 %v10429_v0  ;;  %v1883_v20 = vand.u32 4294901760, %v1882_v17  ;;  %v10808_v36 = vand.u32 4294901760, %v2318_v30 }
  0xba   : > { %661 = vmatprep.mubr.f32.mxu0 %v10429_v0  ;;  %1785 = vmatprep.subr.mxu1 %v10639_v48 }
  0xbb   : > { %1177 = vmatmul.mubr.f32.gmra.mrb[2].mxu1 %v10565_v10  ;;  %1271 = vmatprep.subr.mxu0 %v10643_v49  ;;  %v10824_v42 = vsub.f32 %v2318_v30, %v10808_v36 }
  0xbc   : > { %663 = vmatmul.mubr.f32.gmra.mrb[2].mxu0 %v10565_v10  ;;  %1249 = vmatprep.mubr.f32.mxu1 %v10429_v0 }
  0xbd   : > { %735 = vmatprep.mubr.f32.mxu0 %v10429_v0 }
  0xbf   : > { %1251 = vmatmul.mubr.f32.vlgmr.msra.gmra.mrb[0].mxu1 %v10562_v8 }
  0xc0   : > { %737 = vmatmul.mubr.f32.vlgmr.msra.gmra.mrb[0].mxu0 %v10562_v8  ;;  %1256 = vmatprep.mubr.f32.mxu1 %v10429_v0  ;;  %v1341_v8 = vand.u32 4294901760, %v1340_v14  ;;  %v3379_v14 = vsel %vm229_vm0, %v9869_v9, 0 }
  0xc1   : > { %742 = vmatprep.mubr.f32.mxu0 %v10429_v0  ;;  %1787 = vmatpush1.msra.mxu1 %v10672_v56  ;;  %v10947_v19 = vand.u32 4294901760, %v3379_v14 }
  0xc2   : > { %1273 = vmatpush1.msra.mxu0 %v10676_v57  ;;  %1878 = vmatprep.subr.mxu1 %v1877_v11 }
  0xc3   : > { %1258 = vmatmul.mubr.f32.gmra.mrb[2].mxu1 %v10565_v10  ;;  %1364 = vmatprep.subr.mxu0 %v1363_v16  ;;  %v9870_v16 = vld [vmem:[%s11824_s1 + $0x38] sm:$0xff] }
  0xc4   : > { %744 = vmatmul.mubr.f32.gmra.mrb[2].mxu0 %v10565_v10  ;;  %1850 = vmatprep.mubr.f32.mxu1 %v10429_v0  ;;  %v2306_v10 = vpop.permute.xlu1 %2305 }
  0xc5   : > { %1336 = vmatprep.mubr.f32.mxu0 %v10429_v0  ;;  %v2311_v24 = vsel %vm2309_vm2, %v2304_v23, %v2306_v10 }
  0xc6   : > { %v10781_v27 = vand.u32 4294901760, %v2311_v24 }
  0xc7   : > { %1856 = vmatmul.mubr.f32.vlgmr.msra.gmra.mrb[0].mxu1 %v1341_v8 }
  0xc8   : > { %1342 = vmatmul.mubr.f32.vlgmr.msra.gmra.mrb[0].mxu0 %v1341_v8  ;;  %1861 = vmatprep.mubr.f32.mxu1 %v10429_v0  ;;  %v2308_v25 = vpop.permute.xlu1 %2307  ;;  %v10797_v33 = vsub.f32 %v2311_v24, %v10781_v27  ;;  %v10963_v24 = vsub.f32 %v3379_v14, %v10947_v19 }
  0xc9   : > { %1347 = vmatprep.mubr.f32.mxu0 %v10429_v0  ;;  %1884 = vmatpush1.msra.mxu1 %v1883_v20  ;;  %v10784_v29 = vand.u32 4294901760, %v2308_v25  ;;  %v2312_v31 = vsel %vm2309_vm2, %v2306_v10, %v2308_v25 }
  0xca   : > { %1370 = vmatpush1.msra.mxu0 %v1369_v21  ;;  %1964 = vmatprep.subr.mxu1 %v10657_v52  ;;  %v10812_v37 = vand.u32 4294901760, %v2312_v31  ;;  %v2414_v40 = vand.u32 4294901760, %v10797_v33  ;;  %v3382_v21 = vsel %vm229_vm0, %v9870_v16, 0  ;;  %v10988_v28 = vand.u32 4294901760, %v10963_v24 }
  0xcb   : > { %1867 = vmatmul.mubr.f32.gmra.mrb[2].mxu1 %v1352_v22  ;;  %1450 = vmatprep.subr.mxu0 %v10665_v54  ;;  %v10805_v35 = vsub.f32 %v2308_v25, %v10784_v29  ;;  %v10965_v25 = vand.u32 4294901760, %v3382_v21 }
  0xcc   : > { %1353 = vmatmul.mubr.f32.gmra.mrb[2].mxu0 %v1352_v22  ;;  %1947 = vmatprep.mubr.f32.mxu1 %v10429_v0  ;;  %v10831_v44 = vsub.f32 %v2312_v31, %v10812_v37  ;;  %v2415_v46 = vsub.f32 %v10797_v33, %v2414_v40  ;;  %v3454_v34 = vsub.f32 %v10963_v24, %v10988_v28 }
  0xcd   : > { %1433 = vmatprep.mubr.f32.mxu0 %v10429_v0  ;;  %v2928_v41 = vand.u32 4294901760, %v10805_v35 }
  0xce   : > { %v2934_v50 = vand.u32 4294901760, %v10831_v44  ;;  %v2416_v52 = vand.u32 4294901760, %v2415_v46 }
  0xcf   : > { %1949 = vmatmul.mubr.f32.vlgmr.msra.gmra.mrb[0].mxu1 %v10661_v53  ;;  %v2929_v47 = vsub.f32 %v10805_v35, %v2928_v41 }
  0xd0   : > { %1435 = vmatmul.mubr.f32.vlgmr.msra.gmra.mrb[0].mxu0 %v10661_v53  ;;  %1954 = vmatprep.mubr.f32.mxu1 %v10429_v0 }
  0xd1   : > { %1440 = vmatprep.mubr.f32.mxu0 %v10429_v0  ;;  %1967 = vmatpush1.msra.mxu1 %v10693_v62  ;;  %v2930_v54 = vand.u32 4294901760, %v2929_v47 }
  0xd2   : > { %1453 = vmatpush1.msra.mxu0 %v10702_v5  ;;  %2048 = vmatprep.subr.mxu1 %v10639_v48  ;;  %v3365_v5 = vpop.permute.xlu0 %3364 }
  0xd3   : > { %1956 = vmatmul.mubr.f32.gmra.mrb[2].mxu1 %v10684_v60  ;;  %1534 = vmatprep.subr.mxu0 %v10643_v49 }
  0xd4   : > { %1442 = vmatmul.mubr.f32.gmra.mrb[2].mxu0 %v10684_v60  ;;  %2030 = vmatprep.mubr.f32.mxu1 %v10429_v0 }
  0xd5   : > { %1516 = vmatprep.mubr.f32.mxu0 %v10429_v0 }
  0xd6   : > { %v3363_v11 = vpop.permute.xlu0 %3362 }
  0xd7   : > { %2033 = vmatmul.mubr.f32.vlgmr.msra.gmra.mrb[0].mxu1 %v10682_v59  ;;  %v3371_v18 = vsel %vm3370_vm3, %v3363_v11, %v3365_v5 }
  0xd8   : > { %1519 = vmatmul.mubr.f32.vlgmr.msra.gmra.mrb[0].mxu0 %v10682_v59  ;;  %2038 = vmatprep.mubr.f32.mxu1 %v10429_v0  ;;  %v10955_v22 = vand.u32 4294901760, %v3371_v18 }
  0xd9   : > { %1524 = vmatprep.mubr.f32.mxu0 %v10429_v0  ;;  %2050 = vmatpush1.msra.mxu1 %v10672_v56 }
  0xda   : > { %1536 = vmatpush1.msra.mxu0 %v10676_v57  ;;  %2135 = vmatprep.subr.mxu1 %v1875_v58  ;;  %v2421_v58 = vsub.f32 %v10834_v45, %v2420_v51  ;;  %v10975_v3 = vsub.f32 %v3371_v18, %v10955_v22 }
  0xdb   : > { %2041 = vmatmul.mubr.f32.gmra.mrb[2].mxu1 %v10710_v7  ;;  %1621 = vmatprep.subr.mxu0 %v1361_v61 }
  0xdc   : > { %1527 = vmatmul.mubr.f32.gmra.mrb[2].mxu0 %v10710_v7  ;;  %2113 = vmatprep.mubr.f32.mxu1 %v10429_v0  ;;  %v2422_v62 = vand.u32 4294901760, %v2421_v58  ;;  %v3481_v31 = vand.u32 4294901760, %v10975_v3 }
  0xdd   : > { %1599 = vmatprep.mubr.f32.mxu0 %v10429_v0 }
  0xde   : > { %v3482_v1 = vsub.f32 %v10975_v3, %v3481_v31 }
  0xdf   : > { %2117 = vmatmul.mubr.f32.vlgmr.msra.gmra.mrb[0].mxu1 %v10707_v6 }
  0xe0   : > { %1603 = vmatmul.mubr.f32.vlgmr.msra.gmra.mrb[0].mxu0 %v10707_v6  ;;  %2122 = vmatprep.mubr.f32.mxu1 %v10429_v0 }
  0xe1   : > { %1608 = vmatprep.mubr.f32.mxu0 %v10429_v0  ;;  %2139 = vmatpush1.msra.mxu1 %v1881_v2 }
  0xe2   : > { %1625 = vmatpush1.msra.mxu0 %v1367_v13  ;;  %2218 = vmatprep.subr.mxu1 %v10639_v48  ;;  %v10849_v48 = vand.u32 4294901760, %v10824_v42 }
  0xe3   : > { %2126 = vmatmul.mubr.f32.gmra.mrb[2].mxu1 %v10726_v15  ;;  %1704 = vmatprep.subr.mxu0 %v10643_v49  ;;  %v10852_v49 = vsub.f32 %v2321_v38, %v10826_v43 }
  0xe4   : > { %1612 = vmatmul.mubr.f32.gmra.mrb[2].mxu0 %v10726_v15  ;;  %2202 = vmatprep.mubr.f32.mxu1 %v10429_v0  ;;  %v2393_v55 = vsub.f32 %v10824_v42, %v10849_v48 }
  0xe5   : > { %1688 = vmatprep.mubr.f32.mxu0 %v10429_v0 }
  0xe7   : > { %2204 = vmatmul.mubr.f32.vlgmr.msra.gmra.mrb[0].mxu1 %v10661_v53 }
  0xe8   : > { %1690 = vmatmul.mubr.f32.vlgmr.msra.gmra.mrb[0].mxu0 %v10661_v53  ;;  %2209 = vmatprep.mubr.f32.mxu1 %v10429_v0 }
  0xe9   : > { %1695 = vmatprep.mubr.f32.mxu0 %v10429_v0  ;;  %2220 = vmatpush1.msra.mxu1 %v10672_v56  ;;  %v10865_v56 = vand.u32 4294901760, %v10852_v49 }
  0xea   : > { %1706 = vmatpush1.msra.mxu0 %v10676_v57  ;;  %2838 = vmatprep.subr.mxu1 %v10784_v29  ;;  %v2935_v57 = vsub.f32 %v10831_v44, %v2934_v50 }
  0xeb   : > { %2211 = vmatmul.mubr.f32.gmra.mrb[2].mxu1 %v10684_v60  ;;  %2324 = vmatprep.subr.mxu0 %v10781_v27  ;;  %v2404_v59 = vsub.f32 %v10852_v49, %v10865_v56 }
  0xec   : > { %1697 = vmatmul.mubr.f32.gmra.mrb[2].mxu0 %v10684_v60  ;;  %2283 = vmatprep.mubr.f32.mxu1 %v10429_v0  ;;  %v2936_v61 = vand.u32 4294901760, %v2935_v57 }
  0xed   : > { %1769 = vmatprep.mubr.f32.mxu0 %v10429_v0  ;;  %v2405_v63 = vand.u32 4294901760, %v2404_v59 }
  0xef   : > { %2285 = vmatmul.mubr.f32.vlgmr.msra.gmra.mrb[0].mxu1 %v10661_v53 }
  0xf0   : > { %1771 = vmatmul.mubr.f32.vlgmr.msra.gmra.mrb[0].mxu0 %v10661_v53  ;;  %2290 = vmatprep.mubr.f32.mxu1 %v10429_v0  ;;  %v2394_v53 = vand.u32 4294901760, %v2393_v55 }
  0xf1   : > { %1776 = vmatprep.mubr.f32.mxu0 %v10429_v0  ;;  %2326 = vmatpush1.msra.mxu0 %v10816_v39 }
  0xf2   : > { %2840 = vmatpush1.msra.mxu1 %v10812_v37  ;;  %2417 = vmatprep.subr.mxu0 %v2416_v52 }
  0xf3   : > { %2292 = vmatmul.mubr.f32.gmra.mrb[2].mxu1 %v10684_v60  ;;  %2931 = vmatprep.subr.mxu1 %v2930_v54 }
  0xf4   : > { %1778 = vmatmul.mubr.f32.gmra.mrb[2].mxu0 %v10684_v60  ;;  %2903 = vmatprep.mubr.f32.mxu1 %v10429_v0  ;;  %v3367_v60 = vpop.permute.xlu1 %3366 }
  0xf5   : > { %2389 = vmatprep.mubr.f32.mxu0 %v10429_v0  ;;  %v3372_v6 = vsel %vm3370_vm3, %v3365_v5, %v3367_v60 }
  0xf6   : > { %v10920_v2 = vand.u32 4294901760, %v3372_v6 }
  0xf7   : > { %2909 = vmatmul.mubr.f32.vlgmr.msra.gmra.mrb[0].mxu1 %v2394_v53 }
  0xf8   : > { %2937 = vmatpush1.msra.mxu1 %v2936_v61  ;;  %2395 = vmatmul.mubr.f32.vlgmr.msra.gmra.mrb[0].mxu0 %v2394_v53  ;;  %v3369_v7 = vpop.permute.xlu1 %3368  ;;  %v10939_v17 = vsub.f32 %v3372_v6, %v10920_v2 }
  0xf9   : > { %2423 = vmatpush1.msra.mxu0 %v2422_v62  ;;  %3017 = vmatprep.subr.mxu1 %v10805_v35  ;;  %v10923_v13 = vand.u32 4294901760, %v3369_v7  ;;  %v3373_v15 = vsel %vm3370_vm3, %v3367_v60, %v3369_v7 }
  0xfa   : > { %2503 = vmatprep.subr.mxu0 %v10797_v33  ;;  %2914 = vmatprep.mubr.f32.mxu1 %v10429_v0  ;;  %v10951_v20 = vand.u32 4294901760, %v3373_v15  ;;  %v3475_v10 = vand.u32 4294901760, %v10939_v17 }
  0xfb   : > { %2400 = vmatprep.mubr.f32.mxu0 %v10429_v0  ;;  %2920 = vmatmul.mubr.f32.gmra.mrb[2].mxu1 %v2405_v63  ;;  %v10945_v8 = vsub.f32 %v3369_v7, %v10923_v13 }
  0xfc   : > { %2406 = vmatmul.mubr.f32.gmra.mrb[2].mxu0 %v2405_v63  ;;  %3000 = vmatprep.mubr.f32.mxu1 %v10429_v0  ;;  %v10970_v26 = vsub.f32 %v3373_v15, %v10951_v20  ;;  %v3476_v4 = vsub.f32 %v10939_v17, %v3475_v10 }
  0xfd   : > { %2486 = vmatprep.mubr.f32.mxu0 %v10429_v0  ;;  %v3989_v23 = vand.u32 4294901760, %v10945_v8 }
  0xfe   : > { %v3995_v30 = vand.u32 4294901760, %v10970_v26  ;;  %v3477_v32 = vand.u32 4294901760, %v3476_v4 }
  0xff   : > { %3002 = vmatmul.mubr.f32.vlgmr.msra.gmra.mrb[0].mxu1 %v10808_v36 }
 0x100   : > { %3020 = vmatpush1.msra.mxu1 %v10831_v44  ;;  %2488 = vmatmul.mubr.f32.vlgmr.msra.gmra.mrb[0].mxu0 %v10808_v36  ;;  %v3996_v12 = vsub.f32 %v10970_v26, %v3995_v30 }
 0x101   : > { %2506 = vmatpush1.msra.mxu0 %v10834_v45  ;;  %3101 = vmatprep.subr.mxu1 %v10784_v29  ;;  %v9871_v45 = vld [vmem:[%s11824_s1 + $0x40] sm:$0xff] }
 0x102   : > { %2587 = vmatprep.subr.mxu0 %v10781_v27  ;;  %3007 = vmatprep.mubr.f32.mxu1 %v10429_v0  ;;  %v3997_v38 = vand.u32 4294901760, %v3996_v12 }
 0x103   : > { %2493 = vmatprep.mubr.f32.mxu0 %v10429_v0  ;;  %3009 = vmatmul.mubr.f32.gmra.mrb[2].mxu1 %v10826_v43 }
 0x104   : > { %2495 = vmatmul.mubr.f32.gmra.mrb[2].mxu0 %v10826_v43  ;;  %3083 = vmatprep.mubr.f32.mxu1 %v10429_v0 }
 0x105   : > { %2569 = vmatprep.mubr.f32.mxu0 %v10429_v0 }
 0x107   : > { %3086 = vmatmul.mubr.f32.vlgmr.msra.gmra.mrb[0].mxu1 %v10824_v42 }
 0x108   : > { %3103 = vmatpush1.msra.mxu1 %v10812_v37  ;;  %2572 = vmatmul.mubr.f32.vlgmr.msra.gmra.mrb[0].mxu0 %v10824_v42  ;;  %v4426_v42 = vpop.permute.xlu0 %4425 }
 0x109   : > { %2589 = vmatpush1.msra.mxu0 %v10816_v39  ;;  %3188 = vmatprep.subr.mxu1 %v2928_v41  ;;  %v4428_v41 = vpop.permute.xlu1 %4427 }
 0x10a   : > { %2674 = vmatprep.subr.mxu0 %v2414_v40  ;;  %3091 = vmatprep.mubr.f32.mxu1 %v10429_v0 }
 0x10b   : > { %2577 = vmatprep.mubr.f32.mxu0 %v10429_v0  ;;  %3094 = vmatmul.mubr.f32.gmra.mrb[2].mxu1 %v10852_v49 }
 0x10c   : > { %2580 = vmatmul.mubr.f32.gmra.mrb[2].mxu0 %v10852_v49  ;;  %3166 = vmatprep.mubr.f32.mxu1 %v10429_v0  ;;  %v4424_v47 = vpop.permute.xlu0 %4423  ;;  %v4440_v49 = vsel %vm229_vm0, %v9871_v45, 0 }
 0x10d   : > { %2652 = vmatprep.mubr.f32.mxu0 %v10429_v0  ;;  %v4430_v44 = vpop.permute.xlu1 %4429  ;;  %v4432_v54 = vsel %vm4431_vm4, %v4424_v47, %v4426_v42 }
 0x10e   : > { %v11094_v53 = vand.u32 4294901760, %v4432_v54 }
 0x10f   : > { %3170 = vmatmul.mubr.f32.vlgmr.msra.gmra.mrb[0].mxu1 %v10849_v48 }
 0x110   : > { %3192 = vmatpush1.msra.mxu1 %v2934_v50  ;;  %2656 = vmatmul.mubr.f32.vlgmr.msra.gmra.mrb[0].mxu0 %v10849_v48  ;;  %v11062_v48 = vand.u32 4294901760, %v4430_v44  ;;  %v4434_v50 = vsel %vm4431_vm4, %v4428_v41, %v4430_v44  ;;  %v11112_v5 = vsub.f32 %v4432_v54, %v11094_v53 }
 0x111   : > { %2678 = vmatpush1.msra.mxu0 %v2420_v51  ;;  %3271 = vmatprep.subr.mxu1 %v10784_v29  ;;  %v10991_v29 = vsub.f32 %v3382_v21, %v10965_v25  ;;  %v9872_v51 = vld [vmem:[%s11824_s1 + $0x48] sm:$0xff]  ;;  %v11090_v57 = vand.u32 4294901760, %v4434_v50 }
 0x112   : > { %2757 = vmatprep.subr.mxu0 %v10781_v27  ;;  %3175 = vmatprep.mubr.f32.mxu1 %v10429_v0  ;;  %v3990_v27 = vsub.f32 %v10945_v8, %v3989_v23  ;;  %v11084_v55 = vsub.f32 %v4430_v44, %v11062_v48  ;;  %v4443_v58 = vsel %vm229_vm0, %v9872_v51, 0 }
 0x113   : > { %2661 = vmatprep.mubr.f32.mxu0 %v10429_v0  ;;  %3179 = vmatmul.mubr.f32.gmra.mrb[2].mxu1 %v10865_v56  ;;  %v11004_v35 = vand.u32 4294901760, %v10991_v29  ;;  %v11102_v63 = vand.u32 4294901760, %v4443_v58  ;;  %v11107_v60 = vsub.f32 %v4434_v50, %v11090_v57 }
 0x114   : > { %2665 = vmatmul.mubr.f32.gmra.mrb[2].mxu0 %v10865_v56  ;;  %3255 = vmatprep.mubr.f32.mxu1 %v10429_v0  ;;  %v3991_v33 = vand.u32 4294901760, %v3990_v27  ;;  %v11086_v56 = vand.u32 4294901760, %v4440_v49  ;;  %v5050_v61 = vand.u32 4294901760, %v11084_v55  ;;  %v9873_v27 = vld [vmem:[%s11824_s1 + $0x50] sm:$0xff] }
 0x115   : > { %2741 = vmatprep.mubr.f32.mxu0 %v10429_v0  ;;  %v5056_v11 = vand.u32 4294901760, %v11107_v60 }
 0x116   : > { %v11100_v62 = vsub.f32 %v4440_v49, %v11086_v56  ;;  %v5051_v7 = vsub.f32 %v11084_v55, %v5050_v61 }
 0x117   : > { %3257 = vmatmul.mubr.f32.vlgmr.msra.gmra.mrb[0].mxu1 %v10808_v36  ;;  %v5057_v18 = vsub.f32 %v11107_v60, %v5056_v11 }
 0x118   : > { %3273 = vmatpush1.msra.mxu1 %v10812_v37  ;;  %2743 = vmatmul.mubr.f32.vlgmr.msra.gmra.mrb[0].mxu0 %v10808_v36  ;;  %v3465_v37 = vsub.f32 %v10991_v29, %v11004_v35  ;;  %v11125_v9 = vand.u32 4294901760, %v11100_v62  ;;  %v5052_v15 = vand.u32 4294901760, %v5051_v7  ;;  %v9875_v7 = vld [vmem:[%s11824_s1 + $0x60] sm:$0xff] }
 0x119   : > { %2759 = vmatpush1.msra.mxu0 %v10816_v39  ;;  %3262 = vmatprep.mubr.f32.mxu1 %v10429_v0  ;;  %v3483_v39 = vand.u32 4294901760, %v3482_v1  ;;  %v5058_v21 = vand.u32 4294901760, %v5057_v18 }
 0x11a   : > { %2748 = vmatprep.mubr.f32.mxu0 %v10429_v0  ;;  %3385 = vmatprep.subr.mxu0 %v10920_v2  ;;  %v3466_v40 = vand.u32 4294901760, %v3465_v37  ;;  %v4515_v16 = vsub.f32 %v11100_v62, %v11125_v9 }
 0x11b   : > { %3264 = vmatmul.mubr.f32.gmra.mrb[2].mxu1 %v10826_v43  ;;  %3899 = vmatprep.subr.mxu1 %v10923_v13 }
 0x11c   : > { %2750 = vmatmul.mubr.f32.gmra.mrb[2].mxu0 %v10826_v43  ;;  %3336 = vmatprep.mubr.f32.mxu1 %v10429_v0 }
 0x11d   : > { %2822 = vmatprep.mubr.f32.mxu0 %v10429_v0 }
 0x11f   : > { %3338 = vmatmul.mubr.f32.vlgmr.msra.gmra.mrb[0].mxu1 %v10808_v36 }
 0x120   : > { %2824 = vmatmul.mubr.f32.vlgmr.msra.gmra.mrb[0].mxu0 %v10808_v36  ;;  %3343 = vmatprep.mubr.f32.mxu1 %v10429_v0  ;;  %v3455_v36 = vand.u32 4294901760, %v3454_v34 }
 0x121   : > { %2829 = vmatprep.mubr.f32.mxu0 %v10429_v0  ;;  %3387 = vmatpush1.msra.mxu0 %v10955_v22 }
 0x122   : > { %3901 = vmatpush1.msra.mxu1 %v10951_v20  ;;  %3478 = vmatprep.subr.mxu0 %v3477_v32 }
 0x123   : > { %3345 = vmatmul.mubr.f32.gmra.mrb[2].mxu1 %v10826_v43  ;;  %3992 = vmatprep.subr.mxu1 %v3991_v33  ;;  %v9874_v33 = vld [vmem:[%s11824_s1 + $0x58] sm:$0xff] }
 0x124   : > { %2831 = vmatmul.mubr.f32.gmra.mrb[2].mxu0 %v10826_v43  ;;  %3964 = vmatprep.mubr.f32.mxu1 %v10429_v0  ;;  %v4433_v43 = vsel %vm4431_vm4, %v4426_v42, %v4428_v41  ;;  %v5517_v37 = vsel %vm229_vm0, %v9874_v33, 0 }
 0x125   : > { %3450 = vmatprep.mubr.f32.mxu0 %v10429_v0  ;;  %v11059_v46 = vand.u32 4294901760, %v4433_v43  ;;  %v11238_v42 = vand.u32 4294901760, %v5517_v37 }
 0x127   : > { %3970 = vmatmul.mubr.f32.vlgmr.msra.gmra.mrb[0].mxu1 %v3455_v36  ;;  %v11078_v52 = vsub.f32 %v4433_v43, %v11059_v46 }
 0x128   : > { %3998 = vmatpush1.msra.mxu1 %v3997_v38  ;;  %3456 = vmatmul.mubr.f32.vlgmr.msra.gmra.mrb[0].mxu0 %v3455_v36 }
 0x129   : > { %3484 = vmatpush1.msra.mxu0 %v3483_v39  ;;  %4078 = vmatprep.subr.mxu1 %v10945_v8  ;;  %v4536_v59 = vand.u32 4294901760, %v11078_v52 }
 0x12a   : > { %3564 = vmatprep.subr.mxu0 %v10939_v17  ;;  %3975 = vmatprep.mubr.f32.mxu1 %v10429_v0 }
 0x12b   : > { %3461 = vmatprep.mubr.f32.mxu0 %v10429_v0  ;;  %3981 = vmatmul.mubr.f32.gmra.mrb[2].mxu1 %v3466_v40  ;;  %v4537_v6 = vsub.f32 %v11078_v52, %v4536_v59 }
 0x12c   : > { %3467 = vmatmul.mubr.f32.gmra.mrb[2].mxu0 %v3466_v40  ;;  %4061 = vmatprep.mubr.f32.mxu1 %v10429_v0 }
 0x12d   : > { %3547 = vmatprep.mubr.f32.mxu0 %v10429_v0  ;;  %v4538_v14 = vand.u32 4294901760, %v4537_v6 }
 0x12f   : > { %4063 = vmatmul.mubr.f32.vlgmr.msra.gmra.mrb[0].mxu1 %v10947_v19 }
 0x130   : > { %4081 = vmatpush1.msra.mxu1 %v10970_v26  ;;  %3549 = vmatmul.mubr.f32.vlgmr.msra.gmra.mrb[0].mxu0 %v10947_v19 }
 0x131   : > { %3567 = vmatpush1.msra.mxu0 %v10975_v3  ;;  %4162 = vmatprep.subr.mxu1 %v10923_v13 }
 0x132   : > { %3648 = vmatprep.subr.mxu0 %v10920_v2  ;;  %4068 = vmatprep.mubr.f32.mxu1 %v10429_v0 }
 0x133   : > { %3554 = vmatprep.mubr.f32.mxu0 %v10429_v0  ;;  %4070 = vmatmul.mubr.f32.gmra.mrb[2].mxu1 %v10965_v25 }
 0x134   : > { %3556 = vmatmul.mubr.f32.gmra.mrb[2].mxu0 %v10965_v25  ;;  %4144 = vmatprep.mubr.f32.mxu1 %v10429_v0 }
 0x135   : > { %3630 = vmatprep.mubr.f32.mxu0 %v10429_v0 }
 0x137   : > { %4147 = vmatmul.mubr.f32.vlgmr.msra.gmra.mrb[0].mxu1 %v10963_v24 }
 0x138   : > { %4164 = vmatpush1.msra.mxu1 %v10951_v20  ;;  %3633 = vmatmul.mubr.f32.vlgmr.msra.gmra.mrb[0].mxu0 %v10963_v24  ;;  %v5497_v24 = vpop.permute.xlu0 %5496 }
 0x139   : > { %3650 = vmatpush1.msra.mxu0 %v10955_v22  ;;  %4249 = vmatprep.subr.mxu1 %v3989_v23  ;;  %v5499_v23 = vpop.permute.xlu1 %5498 }
 0x13a   : > { %3735 = vmatprep.subr.mxu0 %v3475_v10  ;;  %4152 = vmatprep.mubr.f32.mxu1 %v10429_v0  ;;  %v5506_v3 = vsel %vm5504_vm5, %v5497_v24, %v5499_v23 }
 0x13b   : > { %3638 = vmatprep.mubr.f32.mxu0 %v10429_v0  ;;  %4155 = vmatmul.mubr.f32.gmra.mrb[2].mxu1 %v10991_v29 }
 0x13c   : > { %3641 = vmatmul.mubr.f32.gmra.mrb[2].mxu0 %v10991_v29  ;;  %4227 = vmatprep.mubr.f32.mxu1 %v10429_v0  ;;  %v5501_v26 = vpop.permute.xlu0 %5500 }
 0x13d   : > { %3713 = vmatprep.mubr.f32.mxu0 %v10429_v0 }
 0x13f   : > { %4231 = vmatmul.mubr.f32.vlgmr.msra.gmra.mrb[0].mxu1 %v10988_v28 }
 0x140   : > { %4253 = vmatpush1.msra.mxu1 %v3995_v30  ;;  %3717 = vmatmul.mubr.f32.vlgmr.msra.gmra.mrb[0].mxu0 %v10988_v28  ;;  %v11195_v28 = vand.u32 4294901760, %v5506_v3  ;;  %v5514_v30 = vsel %vm229_vm0, %v9873_v27, 0  ;;  %v5495_v32 = vpop.permute.xlu0 %5494 }
 0x141   : > { %3739 = vmatpush1.msra.mxu0 %v3481_v31  ;;  %4332 = vmatprep.subr.mxu1 %v10923_v13  ;;  %v4542_v13 = vand.u32 4294901760, %v11112_v5  ;;  %v5507_v31 = vsel %vm5504_vm5, %v5499_v23, %v5501_v26  ;;  %v11221_v12 = vand.u32 4294901760, %v5514_v30  ;;  %v5505_v36 = vsel %vm5504_vm5, %v5495_v32, %v5497_v24 }
 0x142   : > { %3818 = vmatprep.subr.mxu0 %v10920_v2  ;;  %4236 = vmatprep.mubr.f32.mxu1 %v10429_v0  ;;  %v11128_v2 = vsub.f32 %v4443_v58, %v11102_v63  ;;  %v11214_v34 = vsub.f32 %v5506_v3, %v11195_v28  ;;  %v11225_v1 = vand.u32 4294901760, %v5507_v31  ;;  %v11231_v39 = vand.u32 4294901760, %v5505_v36 }
 0x143   : > { %3722 = vmatprep.mubr.f32.mxu0 %v10429_v0  ;;  %4240 = vmatmul.mubr.f32.gmra.mrb[2].mxu1 %v11004_v35  ;;  %v4543_v8 = vsub.f32 %v11112_v5, %v4542_v13  ;;  %v11236_v41 = vsub.f32 %v5514_v30, %v11221_v12 }
 0x144   : > { %3726 = vmatmul.mubr.f32.gmra.mrb[2].mxu0 %v11004_v35  ;;  %4316 = vmatprep.mubr.f32.mxu1 %v10429_v0  ;;  %v11139_v17 = vand.u32 4294901760, %v11128_v2  ;;  %v5610_v38 = vand.u32 4294901760, %v11214_v34  ;;  %v11241_v43 = vsub.f32 %v5507_v31, %v11225_v1  ;;  %v11253_v45 = vsub.f32 %v5505_v36, %v11231_v39 }
 0x145   : > { %3802 = vmatprep.mubr.f32.mxu0 %v10429_v0  ;;  %v11261_v47 = vand.u32 4294901760, %v11236_v41 }
 0x146   : > { %v5611_v44 = vsub.f32 %v11214_v34, %v5610_v38  ;;  %v6130_v49 = vand.u32 4294901760, %v11241_v43  ;;  %v5616_v51 = vand.u32 4294901760, %v11253_v45 }
 0x147   : > { %4318 = vmatmul.mubr.f32.vlgmr.msra.gmra.mrb[0].mxu1 %v10947_v19  ;;  %v5589_v54 = vsub.f32 %v11236_v41, %v11261_v47 }
 0x148   : > { %4334 = vmatpush1.msra.mxu1 %v10951_v20  ;;  %3804 = vmatmul.mubr.f32.vlgmr.msra.gmra.mrb[0].mxu0 %v10947_v19  ;;  %v4526_v20 = vsub.f32 %v11128_v2, %v11139_v17  ;;  %v5612_v50 = vand.u32 4294901760, %v5611_v44  ;;  %v5617_v58 = vsub.f32 %v11253_v45, %v5616_v51 }
 0x149   : > { %3820 = vmatpush1.msra.mxu0 %v10955_v22  ;;  %4323 = vmatprep.mubr.f32.mxu1 %v10429_v0  ;;  %v4544_v22 = vand.u32 4294901760, %v4543_v8 }
 0x14a   : > { %3809 = vmatprep.mubr.f32.mxu0 %v10429_v0  ;;  %4446 = vmatprep.subr.mxu0 %v11059_v46  ;;  %v4527_v10 = vand.u32 4294901760, %v4526_v20 }
 0x14b   : > { %4325 = vmatmul.mubr.f32.gmra.mrb[2].mxu1 %v10965_v25  ;;  %4960 = vmatprep.subr.mxu1 %v11062_v48 }
 0x14c   : > { %3811 = vmatmul.mubr.f32.gmra.mrb[2].mxu0 %v10965_v25  ;;  %4397 = vmatprep.mubr.f32.mxu1 %v10429_v0 }
 0x14d   : > { %3883 = vmatprep.mubr.f32.mxu0 %v10429_v0 }
 0x14f   : > { %4399 = vmatmul.mubr.f32.vlgmr.msra.gmra.mrb[0].mxu1 %v10947_v19 }
 0x150   : > { %3885 = vmatmul.mubr.f32.vlgmr.msra.gmra.mrb[0].mxu0 %v10947_v19  ;;  %4404 = vmatprep.mubr.f32.mxu1 %v10429_v0  ;;  %v4516_v19 = vand.u32 4294901760, %v4515_v16 }
 0x151   : > { %3890 = vmatprep.mubr.f32.mxu0 %v10429_v0  ;;  %4448 = vmatpush1.msra.mxu0 %v11094_v53 }
 0x152   : > { %4962 = vmatpush1.msra.mxu1 %v11090_v57  ;;  %4539 = vmatprep.subr.mxu0 %v4538_v14 }
 0x153   : > { %4406 = vmatmul.mubr.f32.gmra.mrb[2].mxu1 %v10965_v25  ;;  %5053 = vmatprep.subr.mxu1 %v5052_v15  ;;  %v9876_v15 = vld [vmem:[%s11824_s1 + $0x68] sm:$0xff] }
 0x154   : > { %3892 = vmatmul.mubr.f32.gmra.mrb[2].mxu0 %v10965_v25  ;;  %5025 = vmatprep.mubr.f32.mxu1 %v10429_v0  ;;  %v5503_v25 = vpop.permute.xlu1 %5502  ;;  %v6578_v20 = vsel %vm229_vm0, %v9876_v15, 0 }
 0x155   : > { %4511 = vmatprep.mubr.f32.mxu0 %v10429_v0  ;;  %v5508_v4 = vsel %vm5504_vm5, %v5501_v26, %v5503_v25  ;;  %v11373_v24 = vand.u32 4294901760, %v6578_v20 }
 0x156   : > { %v11198_v29 = vand.u32 4294901760, %v5508_v4 }
 0x157   : > { %5031 = vmatmul.mubr.f32.vlgmr.msra.gmra.mrb[0].mxu1 %v4516_v19 }
 0x158   : > { %5059 = vmatpush1.msra.mxu1 %v5058_v21  ;;  %4517 = vmatmul.mubr.f32.vlgmr.msra.gmra.mrb[0].mxu0 %v4516_v19  ;;  %v11219_v35 = vsub.f32 %v5508_v4, %v11198_v29 }
 0x159   : > { %4545 = vmatpush1.msra.mxu0 %v4544_v22  ;;  %5139 = vmatprep.subr.mxu1 %v11084_v55 }
 0x15a   : > { %4625 = vmatprep.subr.mxu0 %v11078_v52  ;;  %5036 = vmatprep.mubr.f32.mxu1 %v10429_v0  ;;  %v6124_v40 = vand.u32 4294901760, %v11219_v35 }
 0x15b   : > { %4522 = vmatprep.mubr.f32.mxu0 %v10429_v0  ;;  %5042 = vmatmul.mubr.f32.gmra.mrb[2].mxu1 %v4527_v10 }
 0x15c   : > { %4528 = vmatmul.mubr.f32.gmra.mrb[2].mxu0 %v4527_v10  ;;  %5122 = vmatprep.mubr.f32.mxu1 %v10429_v0 }
 0x15d   : > { %4608 = vmatprep.mubr.f32.mxu0 %v10429_v0 }
 0x15f   : > { %5124 = vmatmul.mubr.f32.vlgmr.msra.gmra.mrb[0].mxu1 %v11086_v56 }
 0x160   : > { %5142 = vmatpush1.msra.mxu1 %v11107_v60  ;;  %4610 = vmatmul.mubr.f32.vlgmr.msra.gmra.mrb[0].mxu0 %v11086_v56  ;;  %v6561_v60 = vpop.permute.xlu1 %6560 }
 0x161   : > { %4628 = vmatpush1.msra.mxu0 %v11112_v5  ;;  %5223 = vmatprep.subr.mxu1 %v11062_v48 }
 0x162   : > { %4709 = vmatprep.subr.mxu0 %v11059_v46  ;;  %5129 = vmatprep.mubr.f32.mxu1 %v10429_v0 }
 0x163   : > { %4615 = vmatprep.mubr.f32.mxu0 %v10429_v0  ;;  %5131 = vmatmul.mubr.f32.gmra.mrb[2].mxu1 %v11102_v63 }
 0x164   : > { %4617 = vmatmul.mubr.f32.gmra.mrb[2].mxu0 %v11102_v63  ;;  %5205 = vmatprep.mubr.f32.mxu1 %v10429_v0 }
 0x165   : > { %4691 = vmatprep.mubr.f32.mxu0 %v10429_v0 }
 0x167   : > { %5208 = vmatmul.mubr.f32.vlgmr.msra.gmra.mrb[0].mxu1 %v11100_v62 }
 0x168   : > { %5225 = vmatpush1.msra.mxu1 %v11090_v57  ;;  %4694 = vmatmul.mubr.f32.vlgmr.msra.gmra.mrb[0].mxu0 %v11100_v62 }
 0x169   : > { %4711 = vmatpush1.msra.mxu0 %v11094_v53  ;;  %5310 = vmatprep.subr.mxu1 %v5050_v61  ;;  %v5618_v61 = vand.u32 4294901760, %v5617_v58 }
 0x16a   : > { %4796 = vmatprep.subr.mxu0 %v4536_v59  ;;  %5213 = vmatprep.mubr.f32.mxu1 %v10429_v0 }
 0x16b   : > { %4699 = vmatprep.mubr.f32.mxu0 %v10429_v0  ;;  %5216 = vmatmul.mubr.f32.gmra.mrb[2].mxu1 %v11128_v2 }
 0x16c   : > { %4702 = vmatmul.mubr.f32.gmra.mrb[2].mxu0 %v11128_v2  ;;  %5288 = vmatprep.mubr.f32.mxu1 %v10429_v0 }
 0x16d   : > { %4774 = vmatprep.mubr.f32.mxu0 %v10429_v0 }
 0x16f   : > { %5292 = vmatmul.mubr.f32.vlgmr.msra.gmra.mrb[0].mxu1 %v11125_v9 }
 0x170   : > { %5314 = vmatpush1.msra.mxu1 %v5056_v11  ;;  %4778 = vmatmul.mubr.f32.vlgmr.msra.gmra.mrb[0].mxu0 %v11125_v9  ;;  %v6559_v11 = vpop.permute.xlu1 %6558 }
 0x171   : > { %4800 = vmatpush1.msra.mxu0 %v4542_v13  ;;  %5393 = vmatprep.subr.mxu1 %v11062_v48  ;;  %v11264_v48 = vsub.f32 %v5517_v37, %v11238_v42  ;;  %v6575_v13 = vsel %vm229_vm0, %v9875_v7, 0 }
 0x172   : > { %4879 = vmatprep.subr.mxu0 %v11059_v46  ;;  %5297 = vmatprep.mubr.f32.mxu1 %v10429_v0  ;;  %v6125_v46 = vsub.f32 %v11219_v35, %v6124_v40  ;;  %v11357_v8 = vand.u32 4294901760, %v6575_v13 }
 0x173   : > { %4783 = vmatprep.mubr.f32.mxu0 %v10429_v0  ;;  %5301 = vmatmul.mubr.f32.gmra.mrb[2].mxu1 %v11139_v17  ;;  %v11275_v55 = vand.u32 4294901760, %v11264_v48 }
 0x174   : > { %4787 = vmatmul.mubr.f32.gmra.mrb[2].mxu0 %v11139_v17  ;;  %5377 = vmatprep.mubr.f32.mxu1 %v10429_v0  ;;  %v6126_v52 = vand.u32 4294901760, %v6125_v46  ;;  %v6567_v17 = vsel %vm6566_vm6, %v6559_v11, %v6561_v60  ;;  %v11371_v23 = vsub.f32 %v6575_v13, %v11357_v8  ;;  %v7622_v44 = vpop.permute.xlu1 %7621 }
 0x175   : > { %4863 = vmatprep.mubr.f32.mxu0 %v10429_v0  ;;  %v11365_v21 = vand.u32 4294901760, %v6567_v17 }
 0x176   : > { %v11396_v27 = vand.u32 4294901760, %v11371_v23 }
 0x177   : > { %5379 = vmatmul.mubr.f32.vlgmr.msra.gmra.mrb[0].mxu1 %v11086_v56  ;;  %v11383_v26 = vsub.f32 %v6567_v17, %v11365_v21 }
 0x178   : > { %5395 = vmatpush1.msra.mxu1 %v11090_v57  ;;  %4865 = vmatmul.mubr.f32.vlgmr.msra.gmra.mrb[0].mxu0 %v11086_v56  ;;  %v6131_v57 = vsub.f32 %v11241_v43, %v6130_v49  ;;  %v6650_v33 = vsub.f32 %v11371_v23, %v11396_v27 }
 0x179   : > { %4881 = vmatpush1.msra.mxu0 %v11094_v53  ;;  %5384 = vmatprep.mubr.f32.mxu1 %v10429_v0  ;;  %v5590_v53 = vand.u32 4294901760, %v5589_v54  ;;  %v6677_v30 = vand.u32 4294901760, %v11383_v26 }
 0x17a   : > { %4870 = vmatprep.mubr.f32.mxu0 %v10429_v0  ;;  %5520 = vmatprep.subr.mxu0 %v11195_v28  ;;  %v6132_v59 = vand.u32 4294901760, %v6131_v57 }
 0x17b   : > { %5386 = vmatmul.mubr.f32.gmra.mrb[2].mxu1 %v11102_v63  ;;  %6034 = vmatprep.subr.mxu1 %v11198_v29 }
 0x17c   : > { %4872 = vmatmul.mubr.f32.gmra.mrb[2].mxu0 %v11102_v63  ;;  %5458 = vmatprep.mubr.f32.mxu1 %v10429_v0 }
 0x17d   : > { %4944 = vmatprep.mubr.f32.mxu0 %v10429_v0 }
 0x17f   : > { %5460 = vmatmul.mubr.f32.vlgmr.msra.gmra.mrb[0].mxu1 %v11086_v56 }
 0x180   : > { %4946 = vmatmul.mubr.f32.vlgmr.msra.gmra.mrb[0].mxu0 %v11086_v56  ;;  %5465 = vmatprep.mubr.f32.mxu1 %v10429_v0  ;;  %v5600_v56 = vsub.f32 %v11264_v48, %v11275_v55 }
 0x181   : > { %5522 = vmatpush1.msra.mxu0 %v11231_v39  ;;  %6036 = vmatpush1.msra.mxu1 %v11225_v1 }
 0x182   : > { %4951 = vmatprep.mubr.f32.mxu0 %v10429_v0  ;;  %5613 = vmatprep.subr.mxu0 %v5612_v50  ;;  %v5601_v62 = vand.u32 4294901760, %v5600_v56 }
 0x183   : > { %5467 = vmatmul.mubr.f32.gmra.mrb[2].mxu1 %v11102_v63  ;;  %6127 = vmatprep.subr.mxu1 %v6126_v52 }
 0x184   : > { %4953 = vmatmul.mubr.f32.gmra.mrb[2].mxu0 %v11102_v63  ;;  %6099 = vmatprep.mubr.f32.mxu1 %v10429_v0  ;;  %v6563_v63 = vpop.permute.xlu0 %6562 }
 0x185   : > { %5585 = vmatprep.mubr.f32.mxu0 %v10429_v0  ;;  %v6568_v5 = vsel %vm6566_vm6, %v6561_v60, %v6563_v63 }
 0x186   : > { %v11330_v9 = vand.u32 4294901760, %v6568_v5 }
 0x187   : > { %6105 = vmatmul.mubr.f32.vlgmr.msra.gmra.mrb[0].mxu1 %v5590_v53 }
 0x188   : > { %6133 = vmatpush1.msra.mxu1 %v6132_v59  ;;  %5591 = vmatmul.mubr.f32.vlgmr.msra.gmra.mrb[0].mxu0 %v5590_v53  ;;  %v6565_v6 = vpop.permute.xlu0 %6564  ;;  %v11349_v16 = vsub.f32 %v6568_v5, %v11330_v9  ;;  %v199_v53 = vld [vmem:[%s11826_s3 + $0x8] sm:$0xff] }
 0x189   : > { %5619 = vmatpush1.msra.mxu0 %v5618_v61  ;;  %6213 = vmatprep.subr.mxu1 %v11219_v35  ;;  %v11333_v2 = vand.u32 4294901760, %v6565_v6  ;;  %v6569_v14 = vsel %vm6566_vm6, %v6563_v63, %v6565_v6 }
 0x18a   : > { %5699 = vmatprep.subr.mxu0 %v11214_v34  ;;  %6110 = vmatprep.mubr.f32.mxu1 %v10429_v0  ;;  %v11361_v19 = vand.u32 4294901760, %v6569_v14  ;;  %v6671_v22 = vand.u32 4294901760, %v11349_v16 }
 0x18b   : > { %5596 = vmatprep.mubr.f32.mxu0 %v10429_v0  ;;  %6116 = vmatmul.mubr.f32.gmra.mrb[2].mxu1 %v5601_v62  ;;  %v11355_v18 = vsub.f32 %v6565_v6, %v11333_v2 }
 0x18c   : > { %5602 = vmatmul.mubr.f32.gmra.mrb[2].mxu0 %v5601_v62  ;;  %6196 = vmatprep.mubr.f32.mxu1 %v10429_v0  ;;  %v11378_v25 = vsub.f32 %v6569_v14, %v11361_v19  ;;  %v6672_v3 = vsub.f32 %v11349_v16, %v6671_v22 }
 0x18d   : > { %5682 = vmatprep.mubr.f32.mxu0 %v10429_v0  ;;  %v7185_v10 = vand.u32 4294901760, %v11355_v18 }
 0x18e   : > { %v6673_v31 = vand.u32 4294901760, %v6672_v3 }
 0x18f   : > { %6198 = vmatmul.mubr.f32.vlgmr.msra.gmra.mrb[0].mxu1 %v11221_v12  ;;  %v7186_v4 = vsub.f32 %v11355_v18, %v7185_v10 }
 0x190   : > { %6216 = vmatpush1.msra.mxu1 %v11241_v43  ;;  %5684 = vmatmul.mubr.f32.vlgmr.msra.gmra.mrb[0].mxu0 %v11221_v12  ;;  %v7624_v43 = vpop.permute.xlu0 %7623 }
 0x191   : > { %5702 = vmatpush1.msra.mxu0 %v11253_v45  ;;  %6297 = vmatprep.subr.mxu1 %v11198_v29  ;;  %v7187_v32 = vand.u32 4294901760, %v7186_v4  ;;  %v198_v45 = vld [vmem:[%s11826_s3] sm:$0xff]  ;;  %v7629_v46 = vsel %vm7627_vm7, %v7622_v44, %v7624_v43 }
 0x192   : > { %5783 = vmatprep.subr.mxu0 %v11195_v28  ;;  %6203 = vmatprep.mubr.f32.mxu1 %v10429_v0 }
 0x193   : > { %5689 = vmatprep.mubr.f32.mxu0 %v10429_v0  ;;  %6205 = vmatmul.mubr.f32.gmra.mrb[2].mxu1 %v11238_v42 }
 0x194   : > { %5691 = vmatmul.mubr.f32.gmra.mrb[2].mxu0 %v11238_v42  ;;  %6279 = vmatprep.mubr.f32.mxu1 %v10429_v0 }
 0x195   : > { %5765 = vmatprep.mubr.f32.mxu0 %v10429_v0 }
 0x197   : > { %6282 = vmatmul.mubr.f32.vlgmr.msra.gmra.mrb[0].mxu1 %v11236_v41 }
 0x198   : > { %6299 = vmatpush1.msra.mxu1 %v11225_v1  ;;  %5768 = vmatmul.mubr.f32.vlgmr.msra.gmra.mrb[0].mxu0 %v11236_v41  ;;  %v197_v41 = vld [vmem:[%s11825_s2 + $0x8] sm:$0xff] }
 0x199   : > { %5785 = vmatpush1.msra.mxu0 %v11231_v39  ;;  %6384 = vmatprep.subr.mxu1 %v6124_v40  ;;  %v196_v40 = vld [vmem:[%s11825_s2] sm:$0xff] }
 0x19a   : > { %5870 = vmatprep.subr.mxu0 %v5610_v38  ;;  %6287 = vmatprep.mubr.f32.mxu1 %v10429_v0 }
 0x19b   : > { %5773 = vmatprep.mubr.f32.mxu0 %v10429_v0  ;;  %6290 = vmatmul.mubr.f32.gmra.mrb[2].mxu1 %v11264_v48 }
 0x19c   : > { %5776 = vmatmul.mubr.f32.gmra.mrb[2].mxu0 %v11264_v48  ;;  %6362 = vmatprep.mubr.f32.mxu1 %v10429_v0  ;;  %v9877_v48 = vld [vmem:[%s11824_s1 + $0x70] sm:$0xff] }
 0x19d   : > { %5848 = vmatprep.mubr.f32.mxu0 %v10429_v0  ;;  %v7636_v52 = vsel %vm229_vm0, %v9877_v48, 0 }
 0x19e   : > { %v11504_v59 = vand.u32 4294901760, %v7636_v52 }
 0x19f   : > { %6366 = vmatmul.mubr.f32.vlgmr.msra.gmra.mrb[0].mxu1 %v11261_v47 }
 0x1a0   : > { %6388 = vmatpush1.msra.mxu1 %v6130_v49  ;;  %5852 = vmatmul.mubr.f32.vlgmr.msra.gmra.mrb[0].mxu0 %v11261_v47  ;;  %v7626_v47 = vpop.permute.xlu0 %7625  ;;  %v11474_v49 = vand.u32 4294901760, %v7629_v46  ;;  %v11518_v6 = vsub.f32 %v7636_v52, %v11504_v59 }
 0x1a1   : > { %5874 = vmatpush1.msra.mxu0 %v5616_v51  ;;  %6467 = vmatprep.subr.mxu1 %v11198_v29  ;;  %v7191_v29 = vand.u32 4294901760, %v11378_v25  ;;  %v11477_v50 = vand.u32 4294901760, %v7626_v47  ;;  %v7620_v51 = vpop.permute.xlu1 %7619  ;;  %v7630_v54 = vsel %vm7627_vm7, %v7624_v43, %v7626_v47 }
 0x1a2   : > { %5953 = vmatprep.subr.mxu0 %v11195_v28  ;;  %6371 = vmatprep.mubr.f32.mxu1 %v10429_v0  ;;  %v11399_v28 = vsub.f32 %v6578_v20, %v11373_v24  ;;  %v11493_v57 = vsub.f32 %v7629_v46, %v11474_v49  ;;  %v7628_v58 = vsel %vm7627_vm7, %v7620_v51, %v7622_v44  ;;  %v11508_v61 = vand.u32 4294901760, %v7630_v54 }
 0x1a3   : > { %5857 = vmatprep.mubr.f32.mxu0 %v10429_v0  ;;  %6375 = vmatmul.mubr.f32.gmra.mrb[2].mxu1 %v11275_v55  ;;  %v7192_v35 = vsub.f32 %v11378_v25, %v7191_v29  ;;  %v11502_v56 = vsub.f32 %v7626_v47, %v11477_v50  ;;  %v11512_v63 = vand.u32 4294901760, %v7628_v58  ;;  %v11543_v14 = vand.u32 4294901760, %v11518_v6 }
 0x1a4   : > { %5861 = vmatmul.mubr.f32.gmra.mrb[2].mxu0 %v11275_v55  ;;  %6451 = vmatprep.mubr.f32.mxu1 %v10429_v0  ;;  %v11410_v34 = vand.u32 4294901760, %v11399_v28  ;;  %v9878_v55 = vld [vmem:[%s11824_s1 + $0x78] sm:$0xff]  ;;  %v7732_v60 = vand.u32 4294901760, %v11493_v57 }
 0x1a5   : > { %5937 = vmatprep.mubr.f32.mxu0 %v10429_v0  ;;  %v7193_v37 = vand.u32 4294901760, %v7192_v35  ;;  %v7639_v62 = vsel %vm229_vm0, %v9878_v55, 0  ;;  %v8246_v5 = vand.u32 4294901760, %v11502_v56  ;;  %v7711_v20 = vsub.f32 %v11518_v6, %v11543_v14  ;;  %v8683_v4 = vpop.permute.xlu1 %8682  ;;  %v9880_v35 = vld [vmem:[%s11824_s1 + $0x88] sm:$0xff] }
 0x1a6   : > { %v6661_v36 = vsub.f32 %v11399_v28, %v11410_v34  ;;  %v11520_v7 = vand.u32 4294901760, %v7639_v62  ;;  %v7733_v11 = vsub.f32 %v11493_v57, %v7732_v60 }
 0x1a7   : > { %6453 = vmatmul.mubr.f32.vlgmr.msra.gmra.mrb[0].mxu1 %v11221_v12  ;;  %v8247_v13 = vsub.f32 %v11502_v56, %v8246_v5 }
 0x1a8   : > { %6469 = vmatpush1.msra.mxu1 %v11225_v1  ;;  %5939 = vmatmul.mubr.f32.vlgmr.msra.gmra.mrb[0].mxu0 %v11221_v12  ;;  %v6678_v1 = vsub.f32 %v11383_v26, %v6677_v30  ;;  %v11546_v15 = vsub.f32 %v7639_v62, %v11520_v7 }
 0x1a9   : > { %5955 = vmatpush1.msra.mxu0 %v11231_v39  ;;  %6458 = vmatprep.mubr.f32.mxu1 %v10429_v0  ;;  %v6662_v39 = vand.u32 4294901760, %v6661_v36 }
 0x1aa   : > { %5944 = vmatprep.mubr.f32.mxu0 %v10429_v0  ;;  %6581 = vmatprep.subr.mxu0 %v11330_v9  ;;  %v6679_v38 = vand.u32 4294901760, %v6678_v1 }
 0x1ab   : > { %6460 = vmatmul.mubr.f32.gmra.mrb[2].mxu1 %v11238_v42  ;;  %7095 = vmatprep.subr.mxu1 %v11333_v2 }
 0x1ac   : > { %5946 = vmatmul.mubr.f32.gmra.mrb[2].mxu0 %v11238_v42  ;;  %6532 = vmatprep.mubr.f32.mxu1 %v10429_v0 }
 0x1ad   : > { %6018 = vmatprep.mubr.f32.mxu0 %v10429_v0 }
 0x1af   : > { %6534 = vmatmul.mubr.f32.vlgmr.msra.gmra.mrb[0].mxu1 %v11221_v12 }
 0x1b0   : > { %6020 = vmatmul.mubr.f32.vlgmr.msra.gmra.mrb[0].mxu0 %v11221_v12  ;;  %6539 = vmatprep.mubr.f32.mxu1 %v10429_v0  ;;  %v6651_v12 = vand.u32 4294901760, %v6650_v33 }
 0x1b1   : > { %6025 = vmatprep.mubr.f32.mxu0 %v10429_v0  ;;  %6583 = vmatpush1.msra.mxu0 %v11365_v21 }
 0x1b2   : > { %7097 = vmatpush1.msra.mxu1 %v11361_v19  ;;  %6674 = vmatprep.subr.mxu0 %v6673_v31 }
 0x1b3   : > { %6541 = vmatmul.mubr.f32.gmra.mrb[2].mxu1 %v11238_v42  ;;  %7188 = vmatprep.subr.mxu1 %v7187_v32  ;;  %v8681_v32 = vpop.permute.xlu1 %8680 }
 0x1b4   : > { %6027 = vmatmul.mubr.f32.gmra.mrb[2].mxu0 %v11238_v42  ;;  %7160 = vmatprep.mubr.f32.mxu1 %v10429_v0  ;;  %v10438_v42 = vmov 0  }
 0x1b5   : > { %6646 = vmatprep.mubr.f32.mxu0 %v10429_v0  ;;  %10363 = vset.pattern.permute.xlu1 %v10438_v42 }
 0x1b6   : > { %9740 = vperm.xlu1 %10363, %v196_v40   ;;  %10364 = vset.pattern.permute.xlu0 %v10438_v42 }
 0x1b7   : > { %7166 = vmatmul.mubr.f32.vlgmr.msra.gmra.mrb[0].mxu1 %v6651_v12  ;;  %9745 = vperm.xlu0 %10364, %v197_v41  }
 0x1b8   : > { %7194 = vmatpush1.msra.mxu1 %v7193_v37  ;;  %6652 = vmatmul.mubr.f32.vlgmr.msra.gmra.mrb[0].mxu0 %v6651_v12  ;;  %v8689_v12 = vsel %vm8688_vm8, %v8681_v32, %v8683_v4 }
 0x1b9   : > { %6680 = vmatpush1.msra.mxu0 %v6679_v38  ;;  %7274 = vmatprep.subr.mxu1 %v11355_v18  ;;  %v7734_v18 = vand.u32 4294901760, %v7733_v11  ;;  %v11647_v40 = vand.u32 4294901760, %v8689_v12 }
 0x1ba   : > { %6760 = vmatprep.subr.mxu0 %v11349_v16  ;;  %7171 = vmatprep.mubr.f32.mxu1 %v10429_v0 }
 0x1bb   : > { %6657 = vmatprep.mubr.f32.mxu0 %v10429_v0  ;;  %7177 = vmatmul.mubr.f32.gmra.mrb[2].mxu1 %v6662_v39  ;;  %v11665_v46 = vsub.f32 %v8689_v12, %v11647_v40 }
 0x1bc   : > { %6663 = vmatmul.mubr.f32.gmra.mrb[2].mxu0 %v6662_v39  ;;  %7257 = vmatprep.mubr.f32.mxu1 %v10429_v0  ;;  %v8700_v39 = vsel %vm229_vm0, %v9880_v35, 0 }
 0x1bd   : > { %6743 = vmatprep.mubr.f32.mxu0 %v10429_v0  ;;  %9758 = vperm.xlu1 %10363, %v198_v45   ;;  %v11655_v44 = vand.u32 4294901760, %v8700_v39  ;;  %v8799_v52 = vand.u32 4294901760, %v11665_v46 }
 0x1bf   : > { %7259 = vmatmul.mubr.f32.vlgmr.msra.gmra.mrb[0].mxu1 %v11357_v8 }
 0x1c0   : > { %7277 = vmatpush1.msra.mxu1 %v11378_v25  ;;  %6745 = vmatmul.mubr.f32.vlgmr.msra.gmra.mrb[0].mxu0 %v11357_v8 }
 0x1c1   : > { %6763 = vmatpush1.msra.mxu0 %v11383_v26  ;;  %7358 = vmatprep.subr.mxu1 %v11333_v2 }
 0x1c2   : > { %6844 = vmatprep.subr.mxu0 %v11330_v9  ;;  %7264 = vmatprep.mubr.f32.mxu1 %v10429_v0 }
 0x1c3   : > { %6750 = vmatprep.mubr.f32.mxu0 %v10429_v0  ;;  %7266 = vmatmul.mubr.f32.gmra.mrb[2].mxu1 %v11373_v24 }
 0x1c4   : > { %6752 = vmatmul.mubr.f32.gmra.mrb[2].mxu0 %v11373_v24  ;;  %7340 = vmatprep.mubr.f32.mxu1 %v10429_v0 }
 0x1c5   : > { %6826 = vmatprep.mubr.f32.mxu0 %v10429_v0  ;;  %9763 = vperm.xlu1 %10363, %v199_v53  }
 0x1c7   : > { %7343 = vmatmul.mubr.f32.vlgmr.msra.gmra.mrb[0].mxu1 %v11371_v23 }
 0x1c8   : > { %7360 = vmatpush1.msra.mxu1 %v11361_v19  ;;  %6829 = vmatmul.mubr.f32.vlgmr.msra.gmra.mrb[0].mxu0 %v11371_v23 }
 0x1c9   : > { %6846 = vmatpush1.msra.mxu0 %v11365_v21  ;;  %7445 = vmatprep.subr.mxu1 %v7185_v10 }
 0x1ca   : > { %6931 = vmatprep.subr.mxu0 %v6671_v22  ;;  %7348 = vmatprep.mubr.f32.mxu1 %v10429_v0 }
 0x1cb   : > { %6834 = vmatprep.mubr.f32.mxu0 %v10429_v0  ;;  %7351 = vmatmul.mubr.f32.gmra.mrb[2].mxu1 %v11399_v28 }
 0x1cc   : > { %6837 = vmatmul.mubr.f32.gmra.mrb[2].mxu0 %v11399_v28  ;;  %7423 = vmatprep.mubr.f32.mxu1 %v10429_v0 }
 0x1cd   : > { %6909 = vmatprep.mubr.f32.mxu0 %v10429_v0 }
 0x1cf   : > { %7427 = vmatmul.mubr.f32.vlgmr.msra.gmra.mrb[0].mxu1 %v11396_v27 }
 0x1d0   : > { %7449 = vmatpush1.msra.mxu1 %v7191_v29  ;;  %6913 = vmatmul.mubr.f32.vlgmr.msra.gmra.mrb[0].mxu0 %v11396_v27  ;;  %v9879_v29 = vld [vmem:[%s11824_s1 + $0x80] sm:$0xff] }
 0x1d1   : > { %6935 = vmatpush1.msra.mxu0 %v6677_v30  ;;  %7528 = vmatprep.subr.mxu1 %v11333_v2  ;;  %v11530_v2 = vsub.f32 %v7628_v58, %v11512_v63  ;;  %v8697_v33 = vsel %vm229_vm0, %v9879_v29, 0 }
 0x1d2   : > { %7014 = vmatprep.subr.mxu0 %v11330_v9  ;;  %7432 = vmatprep.mubr.f32.mxu1 %v10429_v0  ;;  %v11525_v9 = vsub.f32 %v7630_v54, %v11508_v61  ;;  %v11639_v37 = vand.u32 4294901760, %v8697_v33 }
 0x1d3   : > { %6918 = vmatprep.mubr.f32.mxu0 %v10429_v0  ;;  %7436 = vmatmul.mubr.f32.gmra.mrb[2].mxu1 %v11410_v34  ;;  %v7738_v17 = vand.u32 4294901760, %v11530_v2 }
 0x1d4   : > { %6922 = vmatmul.mubr.f32.gmra.mrb[2].mxu0 %v11410_v34  ;;  %7512 = vmatprep.mubr.f32.mxu1 %v10429_v0  ;;  %v8252_v16 = vand.u32 4294901760, %v11525_v9  ;;  %v11653_v43 = vsub.f32 %v8697_v33, %v11639_v37 }
 0x1d5   : > { %6998 = vmatprep.mubr.f32.mxu0 %v10429_v0  ;;  %v7739_v10 = vsub.f32 %v11530_v2, %v7738_v17 }
 0x1d6   : > { %v8253_v22 = vsub.f32 %v11525_v9, %v8252_v16 }
 0x1d7   : > { %7514 = vmatmul.mubr.f32.vlgmr.msra.gmra.mrb[0].mxu1 %v11357_v8  ;;  %v7740_v26 = vand.u32 4294901760, %v7739_v10 }
 0x1d8   : > { %7530 = vmatpush1.msra.mxu1 %v11361_v19  ;;  %7000 = vmatmul.mubr.f32.vlgmr.msra.gmra.mrb[0].mxu0 %v11357_v8  ;;  %v8248_v19 = vand.u32 4294901760, %v8247_v13  ;;  %v8254_v25 = vand.u32 4294901760, %v8253_v22 }
 0x1d9   : > { %7016 = vmatpush1.msra.mxu0 %v11365_v21  ;;  %7519 = vmatprep.mubr.f32.mxu1 %v10429_v0  ;;  %v11557_v21 = vand.u32 4294901760, %v11546_v15 }
 0x1da   : > { %7005 = vmatprep.mubr.f32.mxu0 %v10429_v0  ;;  %7642 = vmatprep.subr.mxu0 %v11474_v49 }
 0x1db   : > { %7521 = vmatmul.mubr.f32.gmra.mrb[2].mxu1 %v11373_v24  ;;  %8156 = vmatprep.subr.mxu1 %v11477_v50  ;;  %v7722_v23 = vsub.f32 %v11546_v15, %v11557_v21 }
 0x1dc   : > { %7007 = vmatmul.mubr.f32.gmra.mrb[2].mxu0 %v11373_v24  ;;  %7593 = vmatprep.mubr.f32.mxu1 %v10429_v0 }
 0x1dd   : > { %7079 = vmatprep.mubr.f32.mxu0 %v10429_v0  ;;  %v7723_v3 = vand.u32 4294901760, %v7722_v23 }
 0x1df   : > { %7595 = vmatmul.mubr.f32.vlgmr.msra.gmra.mrb[0].mxu1 %v11357_v8 }
 0x1e0   : > { %7081 = vmatmul.mubr.f32.vlgmr.msra.gmra.mrb[0].mxu0 %v11357_v8  ;;  %7600 = vmatprep.mubr.f32.mxu1 %v10429_v0  ;;  %v7712_v8 = vand.u32 4294901760, %v7711_v20 }
 0x1e1   : > { %7086 = vmatprep.mubr.f32.mxu0 %v10429_v0  ;;  %7644 = vmatpush1.msra.mxu0 %v11512_v63 }
 0x1e2   : > { %8158 = vmatpush1.msra.mxu1 %v11508_v61  ;;  %7735 = vmatprep.subr.mxu0 %v7734_v18 }
 0x1e3   : > { %7602 = vmatmul.mubr.f32.gmra.mrb[2].mxu1 %v11373_v24  ;;  %8249 = vmatprep.subr.mxu1 %v8248_v19 }
 0x1e4   : > { %7088 = vmatmul.mubr.f32.gmra.mrb[2].mxu0 %v11373_v24  ;;  %8221 = vmatprep.mubr.f32.mxu1 %v10429_v0  ;;  %v8685_v24 = vpop.permute.xlu0 %8684 }
 0x1e5   : > { %7707 = vmatprep.mubr.f32.mxu0 %v10429_v0  ;;  %v8690_v27 = vsel %vm8688_vm8, %v8683_v4, %v8685_v24 }
 0x1e6   : > { %v11612_v30 = vand.u32 4294901760, %v8690_v27 }
 0x1e7   : > { %8227 = vmatmul.mubr.f32.vlgmr.msra.gmra.mrb[0].mxu1 %v7712_v8 }
 0x1e8   : > { %8255 = vmatpush1.msra.mxu1 %v8254_v25  ;;  %7713 = vmatmul.mubr.f32.vlgmr.msra.gmra.mrb[0].mxu0 %v7712_v8  ;;  %v8687_v28 = vpop.permute.xlu0 %8686  ;;  %v11631_v1 = vsub.f32 %v8690_v27, %v11612_v30 }
 0x1e9   : > { %7741 = vmatpush1.msra.mxu0 %v7740_v26  ;;  %8335 = vmatprep.subr.mxu1 %v11502_v56  ;;  %v11615_v31 = vand.u32 4294901760, %v8687_v28  ;;  %v8691_v34 = vsel %vm8688_vm8, %v8685_v24, %v8687_v28  ;;  %v8800_v56 = vsub.f32 %v11665_v46, %v8799_v52 }
 0x1ea   : > { %7821 = vmatprep.subr.mxu0 %v11493_v57  ;;  %8232 = vmatprep.mubr.f32.mxu1 %v10429_v0  ;;  %v11643_v38 = vand.u32 4294901760, %v8691_v34  ;;  %v8793_v41 = vand.u32 4294901760, %v11631_v1 }
 0x1eb   : > { %7718 = vmatprep.mubr.f32.mxu0 %v10429_v0  ;;  %8238 = vmatmul.mubr.f32.gmra.mrb[2].mxu1 %v7723_v3  ;;  %v11637_v36 = vsub.f32 %v8687_v28, %v11615_v31 }
 0x1ec   : > { %7724 = vmatmul.mubr.f32.gmra.mrb[2].mxu0 %v7723_v3  ;;  %8318 = vmatprep.mubr.f32.mxu1 %v10429_v0  ;;  %v11660_v45 = vsub.f32 %v8691_v34, %v11643_v38  ;;  %v8794_v47 = vsub.f32 %v11631_v1, %v8793_v41 }
 0x1ed   : > { %7804 = vmatprep.mubr.f32.mxu0 %v10429_v0  ;;  %v9307_v42 = vand.u32 4294901760, %v11637_v36 }
 0x1ee   : > { %v9313_v51 = vand.u32 4294901760, %v11660_v45  ;;  %v8795_v54 = vand.u32 4294901760, %v8794_v47 }
 0x1ef   : > { %8320 = vmatmul.mubr.f32.vlgmr.msra.gmra.mrb[0].mxu1 %v11504_v59  ;;  %v9308_v48 = vsub.f32 %v11637_v36, %v9307_v42 }
 0x1f0   : > { %8338 = vmatpush1.msra.mxu1 %v11525_v9  ;;  %7806 = vmatmul.mubr.f32.vlgmr.msra.gmra.mrb[0].mxu0 %v11504_v59  ;;  %v9314_v53 = vsub.f32 %v11660_v45, %v9313_v51 }
 0x1f1   : > { %7824 = vmatpush1.msra.mxu0 %v11530_v2  ;;  %8419 = vmatprep.subr.mxu1 %v11477_v50  ;;  %v9309_v55 = vand.u32 4294901760, %v9308_v48 }
 0x1f2   : > { %7905 = vmatprep.subr.mxu0 %v11474_v49  ;;  %8325 = vmatprep.mubr.f32.mxu1 %v10429_v0  ;;  %v9315_v62 = vand.u32 4294901760, %v9314_v53 }
 0x1f3   : > { %7811 = vmatprep.mubr.f32.mxu0 %v10429_v0  ;;  %8327 = vmatmul.mubr.f32.gmra.mrb[2].mxu1 %v11520_v7 }
 0x1f4   : > { %7813 = vmatmul.mubr.f32.gmra.mrb[2].mxu0 %v11520_v7  ;;  %8401 = vmatprep.mubr.f32.mxu1 %v10429_v0 }
 0x1f5   : > { %7887 = vmatprep.mubr.f32.mxu0 %v10429_v0 }
 0x1f7   : > { %8404 = vmatmul.mubr.f32.vlgmr.msra.gmra.mrb[0].mxu1 %v11518_v6 }
 0x1f8   : > { %8421 = vmatpush1.msra.mxu1 %v11508_v61  ;;  %7890 = vmatmul.mubr.f32.vlgmr.msra.gmra.mrb[0].mxu0 %v11518_v6 }
 0x1f9   : > { %7907 = vmatpush1.msra.mxu0 %v11512_v63  ;;  %8506 = vmatprep.subr.mxu1 %v8246_v5 }
 0x1fa   : > { %7992 = vmatprep.subr.mxu0 %v7732_v60  ;;  %8409 = vmatprep.mubr.f32.mxu1 %v10429_v0 }
 0x1fb   : > { %7895 = vmatprep.mubr.f32.mxu0 %v10429_v0  ;;  %8412 = vmatmul.mubr.f32.gmra.mrb[2].mxu1 %v11546_v15 }
 0x1fc   : > { %7898 = vmatmul.mubr.f32.gmra.mrb[2].mxu0 %v11546_v15  ;;  %8484 = vmatprep.mubr.f32.mxu1 %v10429_v0 }
 0x1fd   : > { %7970 = vmatprep.mubr.f32.mxu0 %v10429_v0 }
 0x1ff   : > { %8488 = vmatmul.mubr.f32.vlgmr.msra.gmra.mrb[0].mxu1 %v11543_v14 }
 0x200   : > { %8510 = vmatpush1.msra.mxu1 %v8252_v16  ;;  %7974 = vmatmul.mubr.f32.vlgmr.msra.gmra.mrb[0].mxu0 %v11543_v14 }
 0x201   : > { %7996 = vmatpush1.msra.mxu0 %v7738_v17  ;;  %8589 = vmatprep.subr.mxu1 %v11477_v50  ;;  %v8781_v50 = vsub.f32 %v8700_v39, %v11655_v44 }
 0x202   : > { %8075 = vmatprep.subr.mxu0 %v11474_v49  ;;  %8493 = vmatprep.mubr.f32.mxu1 %v10429_v0  ;;  %v11678_v49 = vand.u32 4294901760, %v11653_v43 }
 0x203   : > { %7979 = vmatprep.mubr.f32.mxu0 %v10429_v0  ;;  %8497 = vmatmul.mubr.f32.gmra.mrb[2].mxu1 %v11557_v21  ;;  %v11689_v58 = vand.u32 4294901760, %v8781_v50 }
 0x204   : > { %7983 = vmatmul.mubr.f32.gmra.mrb[2].mxu0 %v11557_v21  ;;  %8573 = vmatprep.mubr.f32.mxu1 %v10429_v0  ;;  %v8772_v57 = vsub.f32 %v11653_v43, %v11678_v49 }
 0x205   : > { %8059 = vmatprep.mubr.f32.mxu0 %v10429_v0 }
 0x207   : > { %8575 = vmatmul.mubr.f32.vlgmr.msra.gmra.mrb[0].mxu1 %v11504_v59 }
 0x208   : > { %8591 = vmatpush1.msra.mxu1 %v11508_v61  ;;  %8061 = vmatmul.mubr.f32.vlgmr.msra.gmra.mrb[0].mxu0 %v11504_v59  ;;  %v8783_v61 = vsub.f32 %v8781_v50, %v11689_v58 }
 0x209   : > { %8077 = vmatpush1.msra.mxu0 %v11512_v63  ;;  %8580 = vmatprep.mubr.f32.mxu1 %v10429_v0  ;;  %v8801_v63 = vand.u32 4294901760, %v8800_v56 }
 0x20a   : > { %8066 = vmatprep.mubr.f32.mxu0 %v10429_v0  ;;  %8703 = vmatprep.subr.mxu0 %v11612_v30  ;;  %v8784_v60 = vand.u32 4294901760, %v8783_v61 }
 0x20b   : > { %8582 = vmatmul.mubr.f32.gmra.mrb[2].mxu1 %v11520_v7  ;;  %9217 = vmatprep.subr.mxu1 %v11615_v31 }
 0x20c   : > { %8068 = vmatmul.mubr.f32.gmra.mrb[2].mxu0 %v11520_v7  ;;  %8654 = vmatprep.mubr.f32.mxu1 %v10429_v0 }
 0x20d   : > { %8140 = vmatprep.mubr.f32.mxu0 %v10429_v0 }
 0x20f   : > { %8656 = vmatmul.mubr.f32.vlgmr.msra.gmra.mrb[0].mxu1 %v11504_v59 }
 0x210   : > { %8142 = vmatmul.mubr.f32.vlgmr.msra.gmra.mrb[0].mxu0 %v11504_v59  ;;  %8661 = vmatprep.mubr.f32.mxu1 %v10429_v0  ;;  %v8773_v59 = vand.u32 4294901760, %v8772_v57 }
 0x211   : > { %8147 = vmatprep.mubr.f32.mxu0 %v10429_v0  ;;  %8705 = vmatpush1.msra.mxu0 %v11647_v40 }
 0x212   : > { %9219 = vmatpush1.msra.mxu1 %v11643_v38  ;;  %8796 = vmatprep.subr.mxu0 %v8795_v54 }
 0x213   : > { %8663 = vmatmul.mubr.f32.gmra.mrb[2].mxu1 %v11520_v7  ;;  %9310 = vmatprep.subr.mxu1 %v9309_v55 }
 0x214   : > { %8149 = vmatmul.mubr.f32.gmra.mrb[2].mxu0 %v11520_v7  ;;  %9282 = vmatprep.mubr.f32.mxu1 %v10429_v0 }
 0x215   : > { %8768 = vmatprep.mubr.f32.mxu0 %v10429_v0 }
 0x217   : > { %9288 = vmatmul.mubr.f32.vlgmr.msra.gmra.mrb[0].mxu1 %v8773_v59 }
 0x218   : > { %9316 = vmatpush1.msra.mxu1 %v9315_v62  ;;  %8774 = vmatmul.mubr.f32.vlgmr.msra.gmra.mrb[0].mxu0 %v8773_v59 }
 0x219   : > { %8802 = vmatpush1.msra.mxu0 %v8801_v63  ;;  %9396 = vmatprep.subr.mxu1 %v11637_v36 }
 0x21a   : > { %8882 = vmatprep.subr.mxu0 %v11631_v1  ;;  %9293 = vmatprep.mubr.f32.mxu1 %v10429_v0 }
 0x21b   : > { %8779 = vmatprep.mubr.f32.mxu0 %v10429_v0  ;;  %9299 = vmatmul.mubr.f32.gmra.mrb[2].mxu1 %v8784_v60 }
 0x21c   : > { %8785 = vmatmul.mubr.f32.gmra.mrb[2].mxu0 %v8784_v60  ;;  %9379 = vmatprep.mubr.f32.mxu1 %v10429_v0 }
 0x21d   : > { %8865 = vmatprep.mubr.f32.mxu0 %v10429_v0 }
 0x21f   : > { %9381 = vmatmul.mubr.f32.vlgmr.msra.gmra.mrb[0].mxu1 %v11639_v37 }
 0x220   : > { %9399 = vmatpush1.msra.mxu1 %v11660_v45  ;;  %8867 = vmatmul.mubr.f32.vlgmr.msra.gmra.mrb[0].mxu0 %v11639_v37 }
 0x221   : > { %8885 = vmatpush1.msra.mxu0 %v11665_v46  ;;  %9480 = vmatprep.subr.mxu1 %v11615_v31 }
 0x222   : > { %8966 = vmatprep.subr.mxu0 %v11612_v30  ;;  %9386 = vmatprep.mubr.f32.mxu1 %v10429_v0 }
 0x223   : > { %8872 = vmatprep.mubr.f32.mxu0 %v10429_v0  ;;  %9388 = vmatmul.mubr.f32.gmra.mrb[2].mxu1 %v11655_v44 }
 0x224   : > { %8874 = vmatmul.mubr.f32.gmra.mrb[2].mxu0 %v11655_v44  ;;  %9462 = vmatprep.mubr.f32.mxu1 %v10429_v0 }
 0x225   : > { %8948 = vmatprep.mubr.f32.mxu0 %v10429_v0 }
 0x227   : > { %9465 = vmatmul.mubr.f32.vlgmr.msra.gmra.mrb[0].mxu1 %v11653_v43 }
 0x228   : > { %9482 = vmatpush1.msra.mxu1 %v11643_v38  ;;  %8951 = vmatmul.mubr.f32.vlgmr.msra.gmra.mrb[0].mxu0 %v11653_v43 }
 0x229   : > { %8968 = vmatpush1.msra.mxu0 %v11647_v40  ;;  %9567 = vmatprep.subr.mxu1 %v9307_v42 }
 0x22a   : > { %9053 = vmatprep.subr.mxu0 %v8793_v41  ;;  %9470 = vmatprep.mubr.f32.mxu1 %v10429_v0 }
 0x22b   : > { %8956 = vmatprep.mubr.f32.mxu0 %v10429_v0  ;;  %9473 = vmatmul.mubr.f32.gmra.mrb[2].mxu1 %v8781_v50 }
 0x22c   : > { %8959 = vmatmul.mubr.f32.gmra.mrb[2].mxu0 %v8781_v50  ;;  %9545 = vmatprep.mubr.f32.mxu1 %v10429_v0 }
 0x22d   : > { %9031 = vmatprep.mubr.f32.mxu0 %v10429_v0 }
 0x22f   : > { %9549 = vmatmul.mubr.f32.vlgmr.msra.gmra.mrb[0].mxu1 %v11678_v49 }
 0x230   : > { %9571 = vmatpush1.msra.mxu1 %v9313_v51  ;;  %9035 = vmatmul.mubr.f32.vlgmr.msra.gmra.mrb[0].mxu0 %v11678_v49 }
 0x231   : > { %9057 = vmatpush1.msra.mxu0 %v8799_v52  ;;  %9650 = vmatprep.subr.mxu1 %v11615_v31 }
 0x232   : > { %9136 = vmatprep.subr.mxu0 %v11612_v30  ;;  %9554 = vmatprep.mubr.f32.mxu1 %v10429_v0 }
 0x233   : > { %9040 = vmatprep.mubr.f32.mxu0 %v10429_v0  ;;  %9558 = vmatmul.mubr.f32.gmra.mrb[2].mxu1 %v11689_v58 }
 0x234   : > { %9044 = vmatmul.mubr.f32.gmra.mrb[2].mxu0 %v11689_v58  ;;  %9634 = vmatprep.mubr.f32.mxu1 %v10429_v0 }
 0x235   : > { %9120 = vmatprep.mubr.f32.mxu0 %v10429_v0  ;;  %v9741_v5 = vpop.permute.xlu1 %9740 }
 0x236   : > { %v9746_v16 = vpop.permute.xlu0 %9745 }
 0x237   : > { %9636 = vmatmul.mubr.f32.vlgmr.msra.gmra.mrb[0].mxu1 %v11639_v37 }
 0x238   : > { %9652 = vmatpush1.msra.mxu1 %v11643_v38  ;;  %9122 = vmatmul.mubr.f32.vlgmr.msra.gmra.mrb[0].mxu0 %v11639_v37 }
 0x239   : > { %9138 = vmatpush1.msra.mxu0 %v11647_v40  ;;  %9641 = vmatprep.mubr.f32.mxu1 %v10429_v0 }
 0x23a   : > { %9127 = vmatprep.mubr.f32.mxu0 %v10429_v0 }
 0x23b   : > { %9643 = vmatmul.mubr.f32.gmra.mrb[2].mxu1 %v11655_v44 }
 0x23c   : > { %9129 = vmatmul.mubr.f32.gmra.mrb[2].mxu0 %v11655_v44  ;;  %9715 = vmatprep.mubr.f32.mxu1 %v10429_v0  ;;  %v9759_v7 = vpop.permute.xlu1 %9758 }
 0x23d   : > { %9201 = vmatprep.mubr.f32.mxu0 %v10429_v0 }
 0x23f   : > { %9717 = vmatmul.mubr.f32.vlgmr.msra.gmra.mrb[0].mxu1 %v11639_v37 }
 0x240   : > { %9203 = vmatmul.mubr.f32.vlgmr.msra.gmra.mrb[0].mxu0 %v11639_v37  ;;  %9722 = vmatprep.mubr.f32.mxu1 %v10429_v0 }
 0x241   : > { %9208 = vmatprep.mubr.f32.mxu0 %v10429_v0 }
 0x243   : > { %9724 = vmatmul.mubr.f32.gmra.mrb[2].mxu1 %v11655_v44 }
 0x244   : > { %9210 = vmatmul.mubr.f32.gmra.mrb[2].mxu0 %v11655_v44  ;;  %v9764_v26 = vpop.permute.xlu1 %9763 }
 0x312   : > { %v9718_v6 = vpop.f32.mrb[0].mxu1 }
 0x313   : > { %v9750_v9 = vmul.f32 %v9741_v5, %v9718_v6  ;;  %v9204_v2 = vpop.f32.mrb[0].mxu0  ;;  %v9720_v11 = vpop.f32.mrb[1].mxu1 }
 0x314   : > { %v9748_v13 = vmul.f32 %v9741_v5, %v9204_v2  ;;  %v9751_v14 = vmul.f32 %v9741_v5, %v9720_v11  ;;  %v9206_v15 = vpop.f32.mrb[1].mxu0 }
 0x315   : > { %v9768_v0 = vadd.f32 %v9759_v7, %v9750_v9  ;;  %v9749_v17 = vmul.f32 %v9741_v5, %v9206_v15 }
 0x316   : > { %v9766_v18 = vadd.f32 %v9759_v7, %v9748_v13  ;;  %v9769_v19 = vadd.f32 %v9759_v7, %v9751_v14  ;;  %v9725_v20 = vpop.f32.mrb[2].mxu1 }
 0x317   : > { %9776 = vst [vmem:[%s190_s9 + $0x10] sm:$0xff] %v9768_v0  ;;  %v9767_v21 = vadd.f32 %v9759_v7, %v9749_v17  ;;  %v9754_v22 = vmul.f32 %v9746_v16, %v9725_v20  ;;  %v9211_v10 = vpop.f32.mrb[2].mxu0  ;;  %v9727_v8 = vpop.f32.mrb[3].mxu1 }
 0x318   : > { %9774 = vst [vmem:[%s190_s9] sm:$0xff] %v9766_v18  ;;  %9778 = vst.msk [vmem:[%s190_s9 + $0x18] sm:$0xff] %vm9777_vm9, %v9769_v19  ;;  %v9752_v23 = vmul.f32 %v9746_v16, %v9211_v10  ;;  %v9755_v25 = vmul.f32 %v9746_v16, %v9727_v8  ;;  %v9213_v3 = vpop.f32.mrb[3].mxu0 }
 0x319   : > { %9775 = vst [vmem:[%s190_s9 + $0x8] sm:$0xff] %v9767_v21  ;;  %v9772_v24 = vadd.f32 %v9764_v26, %v9754_v22  ;;  %v9753_v4 = vmul.f32 %v9746_v16, %v9213_v3 }
 0x31a   : > { %v9770_v27 = vadd.f32 %v9764_v26, %v9752_v23  ;;  %v9773_v28 = vadd.f32 %v9764_v26, %v9755_v25 }
 0x31b   : > { %9781 = vst [vmem:[%s190_s9 + $0x30] sm:$0xff] %v9772_v24  ;;  %v9771_v29 = vadd.f32 %v9764_v26, %v9753_v4 }
 0x31c   : > { %9779 = vst [vmem:[%s190_s9 + $0x20] sm:$0xff] %v9770_v27  ;;  %9782 = vst.msk [vmem:[%s190_s9 + $0x38] sm:$0xff] %vm9777_vm9, %v9773_v28 }
 0x31d   : > { %9780 = vst [vmem:[%s190_s9 + $0x28] sm:$0xff] %v9771_v29 }
 0x31e   : > { %10378 = shalt.err (!%p10375_p3)
}
 0x31f   : > { %s10379_s28 = scalar_lea.hbm %s11775_s14, 1024  ;;  %s10383_s5 = scalar_lea.hbm %s11827_s4, 2048 }
 0x320   : > { %p10380_p4 = scmp.ne.s32.totalorder %s11775_s14, %s10379_s28  ;;  %p10384_p9 = scmp.lt.u32.totalorder %s11775_s14, %s11827_s4 }
 0x321   : > { %p10385_p10 = scmp.lt.u32.totalorder %s10383_s5, %s10379_s28  ;;  %p10387_p12 = scmp.lt.u32.totalorder %s10379_s28, %s11775_s14 }
 0x322   : > { %p10381_p7 = pnand %p10380_p4, %p10505_p5 }
 0x323   : > { %p10386_p11 = por %p10385_p10, %p10384_p9 }
 0x324   : > { %p10382_p8 = pneg %p10381_p7 }
 0x325   : > { %p10388_p13 = por %p10387_p12, %p10386_p11 }
 0x327   : > { %p10389_p0 = pnand %p10388_p13, %p10382_p8 }
 0x329   : > { %10392 = shalt.err (!%p10389_p0)
}
 0x32a   : > { %s10440_s8 = smov 512   ;;  %s10441_s9 = smov 32  }
 0x32b   : > { %10312 = dma.vmem_to_hbm [thread:$0]  (%p10505_p5), %s11777_s11, 1024, %s11775_s14, %s11782_s19, %s10440_s8, %s10440_s8, %s10441_s9  }
 0x32c PF: > { %p10318_p1 = scmp.ge.s32.totalorder %s10427_s18, 2  ;;  %s9812_s10 = sand.u32 1, %s10415_s15  }
 0x32d   : > { %s9813_s12 = scalar_lea.sflag [#allocation3], %s9812_s10 }
 0x32e   : > { %p10315_p2 = pnand %p10318_p1, %p10509_p6 }
 0x330   : > { %10410 = dma.done.wait (!%p10315_p2), %s9813_s12, 1024  }
 0x331   : > { %10412 = vsyncadd (!%p10315_p2), %s9813_s12, 4294966272  ;;  %p14_p3 = scmp.ge.s32.totalorder %s10492_s21, 4   ;;  %s11830_s15 = smov %s10419_s16 }
 0x332   : > { %s11831_s16 = smov %s10423_s17  ;;  %s11832_s17 = smov %s10503_s24 }
 0x333   : > { %s11833_s18 = smov %s10492_s21  ;;  %16 = sbr.rel (!%p14_p3) target bundleno = 3 (0x3), region = 79 }
 0x33a   :  { %9818 = vsyncpa [#allocation3], 1 }
 0x33b   :  { %9820 = vsyncpa [#allocation3 + $0x1], 1 }

</bundles_post_ra>
